<compile_context>
chip_gen: v7x
topology: tpu7x:2x2x1
jax: 0.10.0
libtpu: 0.0.40
codegen_flags: <defaults>
</compile_context>

<pallas_src>
import functools

import jax
import jax.numpy as jnp
from jax.experimental import pallas as pl
from jax.experimental.pallas import tpu as pltpu


def _fused_downsample_kernel(x_top_ref, x_main_ref, x_bot_ref, w_ref, o_ref,
                             *, matmul_dtype):
    # x_top_ref:  (1, 1,  W, Cin)   input row t*TH - 1 (clamped; zeroed at t==0)
    # x_main_ref: (1, TH, W, Cin)   input rows [t*TH, t*TH + TH)
    # x_bot_ref:  (1, 1,  W, Cin)   input row t*TH + TH (clamped; zeroed at last t)
    # w_ref:      (16*Cin, 4*Cout)  fused 4x4/stride-2 weight (im2col RHS)
    # o_ref:      (1, (TH//2)*(W//2), 4*Cout)   final token layout
    TH = x_main_ref.shape[1]
    W = x_main_ref.shape[2]
    Cin = x_main_ref.shape[3]
    th2, w2 = TH // 2, W // 2
    n_out_ch = o_ref.shape[2]
    dt = x_main_ref.dtype

    t = pl.program_id(1)
    n_t = pl.num_programs(1)

    # In-kernel "SAME" padding: zero the halo rows on boundary tiles, add zero
    # columns in VMEM.  No padded copy of the input ever hits HBM.
    top = x_top_ref[0] * (t > 0).astype(dt)              # (1, W, Cin)
    bot = x_bot_ref[0] * (t < n_t - 1).astype(dt)        # (1, W, Cin)
    rows = jnp.concatenate([top, x_main_ref[0], bot], axis=0)   # (TH+2, W, Cin)
    zcol = jnp.zeros((TH + 2, 1, Cin), dt)
    xt = jnp.concatenate([zcol, rows, zcol], axis=1)             # (TH+2, W+2, Cin)

    rhs = w_ref[...]
    if matmul_dtype is not None:                         # bf16 path for v6e/v7x
        xt = xt.astype(matmul_dtype)
        rhs = rhs.astype(matmul_dtype)

    # Parity-split the tile so every (di, dj) tap of the 4x4/stride-2 patch is
    # a *contiguous* slice:  s[(a, b)][h, w, :] == xt[2h + a, 2w + b, :]
    xc = xt.reshape(TH + 2, w2 + 1, 2, Cin)
    s = {}
    for b in range(2):
        col_b = xc[:, :, b, :].reshape(th2 + 1, 2, w2 + 1, Cin)
        for a in range(2):
            s[(a, b)] = col_b[:, a, :, :]                # (th2+1, w2+1, Cin)

    # im2col LHS, tap order k = di*4 + dj (matches the RHS row layout).
    taps = []
    for di in range(4):
        a, p = di % 2, di // 2
        for dj in range(4):
            b, q = dj % 2, dj // 2
            taps.append(s[(a, b)][p:p + th2, q:q + w2, :])   # (th2, w2, Cin)
    patches = jnp.concatenate(taps, axis=-1)                 # (th2, w2, 16*Cin)
    lhs = patches.reshape(th2 * w2, 16 * Cin)

    out = jnp.dot(lhs, rhs, preferred_element_type=jnp.float32)
    o_ref[...] = out.reshape(1, th2 * w2, n_out_ch).astype(o_ref.dtype)


def _fused_weight(weight):
    """OIHW (Cout, Cin, 3, 3) -> (16*Cin, 4*Cout) im2col RHS of the fused
    (3x3 conv, pad 1) + PixelUnshuffle(2) operator.

    Output channel ordering matches PyTorch PixelUnshuffle: c' = co*4 + i*2 + j,
    where (i, j) is the (row, col) sub-pixel offset.
    """
    cout, cin = weight.shape[0], weight.shape[1]
    w_hwio = jnp.transpose(weight, (2, 3, 1, 0))            # (3, 3, Cin, Cout)
    wf = jnp.zeros((4, 4, cin, cout, 2, 2), weight.dtype)
    for i in range(2):
        for j in range(2):
            wf = wf.at[i:i + 3, j:j + 3, :, :, i, j].set(w_hwio)
    # rows: (di*4 + dj)*Cin + ci   cols: co*4 + i*2 + j
    return wf.reshape(16 * cin, 4 * cout)


def _pick_tile_rows(H, W, C, target_bytes=2 * 1024 * 1024):
    """Largest even divisor of H whose f32 input tile (lanes padded to >=128)
    fits the per-step VMEM budget, preferring >=2 row tiles for pipelining."""
    bytes_per_row = W * max(C, 128) * 4
    valid = [th for th in range(2, H + 1, 2)
             if H % th == 0 and (((th // 2) * (W // 2)) % 8 == 0 or th == H)]
    fitting = [th for th in valid if th * bytes_per_row <= target_bytes]
    pipelined = [th for th in fitting if H // th >= 2]
    if pipelined:
        return max(pipelined)
    return max(fitting) if fitting else min(valid)


def downsample_forward(x, weight, H, W, *, matmul_dtype=None, tile_rows=None):
    """Downsample.forward(x, H, W).

    x:      (B, H*W, C) float32, tokens in row-major (h*W + w) order
    weight: (C//2, C, 3, 3) PyTorch OIHW conv weight (bias-free)
    returns (B, (H//2)*(W//2), 2*C)
    """
    B, L, C = x.shape
    assert L == H * W
    assert H % 2 == 0 and W % 2 == 0
    assert weight.shape == (C // 2, C, 3, 3)
    cout = weight.shape[0]
    n_out = 4 * cout                                        # == 2*C

    th = tile_rows if tile_rows is not None else _pick_tile_rows(H, W, C)
    assert H % th == 0 and th % 2 == 0
    th2, w2 = th // 2, W // 2

    # b (h w) c -> b h w c : a free reshape (no data movement, no padding pass).
    x_img = x.reshape(B, H, W, C)
    w_rhs = _fused_weight(weight)                           # (16*C, 2*C)

    kernel = functools.partial(_fused_downsample_kernel, matmul_dtype=matmul_dtype)

    out = pl.pallas_call(
        kernel,
        out_shape=jax.ShapeDtypeStruct((B, (H // 2) * (W // 2), n_out), x.dtype),
        grid=(B, H // th),
        in_specs=[
            # top halo: row t*th - 1 (clamped to 0; zero-masked in-kernel at t==0)
            pl.BlockSpec((1, 1, W, C),
                         lambda b, t: (b, jnp.maximum(t * th - 1, 0), 0, 0)),
            # main slab: rows [t*th, t*th + th)
            pl.BlockSpec((1, th, W, C), lambda b, t: (b, t, 0, 0)),
            # bottom halo: row t*th + th (clamped; zero-masked at the last t)
            pl.BlockSpec((1, 1, W, C),
                         lambda b, t: (b, jnp.minimum((t + 1) * th, H - 1), 0, 0)),
            # fused weight: one contiguous RHS tile, resident across the grid
            pl.BlockSpec((16 * C, n_out), lambda b, t: (0, 0)),
        ],
        out_specs=pl.BlockSpec((1, th2 * w2, n_out), lambda b, t: (b, t, 0)),
        compiler_params=pltpu.CompilerParams(
            dimension_semantics=("parallel", "parallel"),
            vmem_limit_bytes=48 * 1024 * 1024,
        ),
    )(x_img, x_img, x_img, w_rhs)
    return out


def _reference(x, weight, H, W):
    """Pure-JAX reference (mirrors the PyTorch module exactly)."""
    B, L, C = x.shape
    cout = weight.shape[0]
    x_nchw = jnp.transpose(x.reshape(B, H, W, C), (0, 3, 1, 2))
    conv = jax.lax.conv_general_dilated(
        x_nchw, weight, window_strides=(1, 1), padding="SAME",
        dimension_numbers=("NCHW", "OIHW", "NCHW"),
    )
    y = conv.reshape(B, cout, H // 2, 2, W // 2, 2)
    y = jnp.transpose(y, (0, 1, 3, 5, 2, 4)).reshape(B, cout * 4, H // 2, W // 2)
    return jnp.transpose(y, (0, 2, 3, 1)).reshape(B, (H // 2) * (W // 2), cout * 4)


if __name__ == "__main__":
    # Small, deterministic example consistent with the module:
    # n_feat = 4 channels, batch = 2, spatial 16x16 -> seq len 256.
    B, C, H, W = 2, 4, 16, 16
    key = jax.random.PRNGKey(0)
    kx, kw = jax.random.split(key)

    x = jax.random.normal(kx, (B, H * W, C), dtype=jnp.float32)
    weight = 0.1 * jax.random.normal(kw, (C // 2, C, 3, 3), dtype=jnp.float32)

    out = jax.block_until_ready(downsample_forward(x, weight, H, W))
    ref = _reference(x, weight, H, W)

    assert out.shape == (B, (H // 2) * (W // 2), 2 * C), out.shape
    assert jnp.allclose(out, ref, atol=1e-4, rtol=1e-4), "mismatch vs reference"

    print("KERNEL_OK")
</pallas_src>

<mosaic_0001>
module attributes {stable_mosaic.version = 11 : i64} {
  func.func @_fused_downsample_kernel(%arg0: i32, %arg1: i32, %arg2: memref<1x1x16x4xf32, #tpu.memory_space<vmem>>, %arg3: memref<1x8x16x4xf32, #tpu.memory_space<vmem>>, %arg4: memref<1x1x16x4xf32, #tpu.memory_space<vmem>>, %arg5: memref<64x8xf32, #tpu.memory_space<vmem>>, %arg6: memref<1x32x8xf32, #tpu.memory_space<vmem>>) attributes {dimension_semantics = [#tpu.dimension_semantics<parallel>, #tpu.dimension_semantics<parallel>], iteration_bounds = array<i64: 2, 2>, scalar_prefetch = 0 : i64, scratch_operands = 0 : i64, tpu.core_type = #tpu.core_type<tc>, window_params = [{transform_indices = @transform_0, window_bounds = array<i64: 1, 1, 16, 4>}, {transform_indices = @transform_1, window_bounds = array<i64: 1, 8, 16, 4>}, {transform_indices = @transform_2, window_bounds = array<i64: 1, 1, 16, 4>}, {pipeline_mode = #tpu.pipeline_mode<synchronous>, transform_indices = @transform_3, window_bounds = array<i64: 64, 8>}, {transform_indices = @transform_4, window_bounds = array<i64: 1, 32, 8>}]} {
    %c0 = arith.constant 0 : index
    %c0_0 = arith.constant 0 : index
    %c0_1 = arith.constant 0 : index
    %c0_2 = arith.constant 0 : index
    %0 = vector.load %arg2[%c0, %c0_0, %c0_1, %c0_2] : memref<1x1x16x4xf32, #tpu.memory_space<vmem>>, vector<1x1x16x4xf32>
    %1 = vector.shape_cast %0 : vector<1x1x16x4xf32> to vector<1x16x4xf32>
    %c0_i32 = arith.constant 0 : i32
    %2 = arith.cmpi sgt, %arg1, %c0_i32 : i32
    %3 = arith.extui %2 : i1 to i32
    %4 = arith.sitofp %3 : i32 to f32
    %5 = vector.broadcast %4 : f32 to vector<1x16x4xf32>
    %6 = arith.mulf %1, %5 : vector<1x16x4xf32>
    %c0_3 = arith.constant 0 : index
    %c0_4 = arith.constant 0 : index
    %c0_5 = arith.constant 0 : index
    %c0_6 = arith.constant 0 : index
    %7 = vector.load %arg4[%c0_3, %c0_4, %c0_5, %c0_6] : memref<1x1x16x4xf32, #tpu.memory_space<vmem>>, vector<1x1x16x4xf32>
    %8 = vector.shape_cast %7 : vector<1x1x16x4xf32> to vector<1x16x4xf32>
    %c1_i32 = arith.constant 1 : i32
    %9 = arith.cmpi slt, %arg1, %c1_i32 : i32
    %10 = arith.extui %9 : i1 to i32
    %11 = arith.sitofp %10 : i32 to f32
    %12 = vector.broadcast %11 : f32 to vector<1x16x4xf32>
    %13 = arith.mulf %8, %12 : vector<1x16x4xf32>
    %c0_7 = arith.constant 0 : index
    %c0_8 = arith.constant 0 : index
    %c0_9 = arith.constant 0 : index
    %c0_10 = arith.constant 0 : index
    %14 = vector.load %arg3[%c0_7, %c0_8, %c0_9, %c0_10] : memref<1x8x16x4xf32, #tpu.memory_space<vmem>>, vector<1x8x16x4xf32>
    %15 = vector.shape_cast %14 : vector<1x8x16x4xf32> to vector<8x16x4xf32>
    %16 = tpu.concatenate %6, %15, %13 in 0 : vector<1x16x4xf32>, vector<8x16x4xf32>, vector<1x16x4xf32> -> vector<10x16x4xf32>
    %cst = arith.constant 0.000000e+00 : f32
    %17 = vector.broadcast %cst : f32 to vector<10x1x4xf32>
    %18 = tpu.concatenate %17, %16, %17 in 1 : vector<10x1x4xf32>, vector<10x16x4xf32>, vector<10x1x4xf32> -> vector<10x18x4xf32>
    %c0_11 = arith.constant 0 : index
    %c0_12 = arith.constant 0 : index
    %19 = vector.load %arg5[%c0_11, %c0_12] : memref<64x8xf32, #tpu.memory_space<vmem>>, vector<64x8xf32>
    %20 = vector.shape_cast %18 : vector<10x18x4xf32> to vector<10x9x2x4xf32>
    %21 = vector.extract_strided_slice %20 {offsets = [0, 0, 0, 0], sizes = [10, 9, 1, 4], strides = [1, 1, 1, 1]} : vector<10x9x2x4xf32> to vector<10x9x1x4xf32>
    %22 = vector.shape_cast %21 : vector<10x9x1x4xf32> to vector<10x9x4xf32>
    %23 = vector.shape_cast %22 : vector<10x9x4xf32> to vector<5x2x9x4xf32>
    %24 = vector.extract_strided_slice %23 {offsets = [0, 0, 0, 0], sizes = [5, 1, 9, 4], strides = [1, 1, 1, 1]} : vector<5x2x9x4xf32> to vector<5x1x9x4xf32>
    %25 = vector.shape_cast %24 : vector<5x1x9x4xf32> to vector<5x9x4xf32>
    %26 = vector.extract_strided_slice %23 {offsets = [0, 1, 0, 0], sizes = [5, 1, 9, 4], strides = [1, 1, 1, 1]} : vector<5x2x9x4xf32> to vector<5x1x9x4xf32>
    %27 = vector.shape_cast %26 : vector<5x1x9x4xf32> to vector<5x9x4xf32>
    %28 = vector.extract_strided_slice %20 {offsets = [0, 0, 1, 0], sizes = [10, 9, 1, 4], strides = [1, 1, 1, 1]} : vector<10x9x2x4xf32> to vector<10x9x1x4xf32>
    %29 = vector.shape_cast %28 : vector<10x9x1x4xf32> to vector<10x9x4xf32>
    %30 = vector.shape_cast %29 : vector<10x9x4xf32> to vector<5x2x9x4xf32>
    %31 = vector.extract_strided_slice %30 {offsets = [0, 0, 0, 0], sizes = [5, 1, 9, 4], strides = [1, 1, 1, 1]} : vector<5x2x9x4xf32> to vector<5x1x9x4xf32>
    %32 = vector.shape_cast %31 : vector<5x1x9x4xf32> to vector<5x9x4xf32>
    %33 = vector.extract_strided_slice %30 {offsets = [0, 1, 0, 0], sizes = [5, 1, 9, 4], strides = [1, 1, 1, 1]} : vector<5x2x9x4xf32> to vector<5x1x9x4xf32>
    %34 = vector.shape_cast %33 : vector<5x1x9x4xf32> to vector<5x9x4xf32>
    %35 = vector.extract_strided_slice %25 {offsets = [0, 0, 0], sizes = [4, 8, 4], strides = [1, 1, 1]} : vector<5x9x4xf32> to vector<4x8x4xf32>
    %36 = vector.extract_strided_slice %32 {offsets = [0, 0, 0], sizes = [4, 8, 4], strides = [1, 1, 1]} : vector<5x9x4xf32> to vector<4x8x4xf32>
    %37 = vector.extract_strided_slice %25 {offsets = [0, 1, 0], sizes = [4, 8, 4], strides = [1, 1, 1]} : vector<5x9x4xf32> to vector<4x8x4xf32>
    %38 = vector.extract_strided_slice %32 {offsets = [0, 1, 0], sizes = [4, 8, 4], strides = [1, 1, 1]} : vector<5x9x4xf32> to vector<4x8x4xf32>
    %39 = vector.extract_strided_slice %27 {offsets = [0, 0, 0], sizes = [4, 8, 4], strides = [1, 1, 1]} : vector<5x9x4xf32> to vector<4x8x4xf32>
    %40 = vector.extract_strided_slice %34 {offsets = [0, 0, 0], sizes = [4, 8, 4], strides = [1, 1, 1]} : vector<5x9x4xf32> to vector<4x8x4xf32>
    %41 = vector.extract_strided_slice %27 {offsets = [0, 1, 0], sizes = [4, 8, 4], strides = [1, 1, 1]} : vector<5x9x4xf32> to vector<4x8x4xf32>
    %42 = vector.extract_strided_slice %34 {offsets = [0, 1, 0], sizes = [4, 8, 4], strides = [1, 1, 1]} : vector<5x9x4xf32> to vector<4x8x4xf32>
    %43 = vector.extract_strided_slice %25 {offsets = [1, 0, 0], sizes = [4, 8, 4], strides = [1, 1, 1]} : vector<5x9x4xf32> to vector<4x8x4xf32>
    %44 = vector.extract_strided_slice %32 {offsets = [1, 0, 0], sizes = [4, 8, 4], strides = [1, 1, 1]} : vector<5x9x4xf32> to vector<4x8x4xf32>
    %45 = vector.extract_strided_slice %25 {offsets = [1, 1, 0], sizes = [4, 8, 4], strides = [1, 1, 1]} : vector<5x9x4xf32> to vector<4x8x4xf32>
    %46 = vector.extract_strided_slice %32 {offsets = [1, 1, 0], sizes = [4, 8, 4], strides = [1, 1, 1]} : vector<5x9x4xf32> to vector<4x8x4xf32>
    %47 = vector.extract_strided_slice %27 {offsets = [1, 0, 0], sizes = [4, 8, 4], strides = [1, 1, 1]} : vector<5x9x4xf32> to vector<4x8x4xf32>
    %48 = vector.extract_strided_slice %34 {offsets = [1, 0, 0], sizes = [4, 8, 4], strides = [1, 1, 1]} : vector<5x9x4xf32> to vector<4x8x4xf32>
    %49 = vector.extract_strided_slice %27 {offsets = [1, 1, 0], sizes = [4, 8, 4], strides = [1, 1, 1]} : vector<5x9x4xf32> to vector<4x8x4xf32>
    %50 = vector.extract_strided_slice %34 {offsets = [1, 1, 0], sizes = [4, 8, 4], strides = [1, 1, 1]} : vector<5x9x4xf32> to vector<4x8x4xf32>
    %51 = tpu.concatenate %35, %36, %37, %38, %39, %40, %41, %42, %43, %44, %45, %46, %47, %48, %49, %50 in 2 : vector<4x8x4xf32>, vector<4x8x4xf32>, vector<4x8x4xf32>, vector<4x8x4xf32>, vector<4x8x4xf32>, vector<4x8x4xf32>, vector<4x8x4xf32>, vector<4x8x4xf32>, vector<4x8x4xf32>, vector<4x8x4xf32>, vector<4x8x4xf32>, vector<4x8x4xf32>, vector<4x8x4xf32>, vector<4x8x4xf32>, vector<4x8x4xf32>, vector<4x8x4xf32> -> vector<4x8x64xf32>
    %52 = vector.shape_cast %51 : vector<4x8x64xf32> to vector<32x64xf32>
    %cst_13 = arith.constant dense<0.000000e+00> : vector<32x8xf32>
    %53 = tpu.matmul %52, %19, %cst_13 {dimension_numbers = #tpu.dot_dimension_numbers<[1], [0], [0], [1], [0, 0, 1, 1], [], []>} : vector<32x64xf32>, vector<64x8xf32>, vector<32x8xf32> -> vector<32x8xf32>
    %54 = vector.shape_cast %53 : vector<32x8xf32> to vector<1x32x8xf32>
    %c0_14 = arith.constant 0 : index
    %c0_15 = arith.constant 0 : index
    %c0_16 = arith.constant 0 : index
    %55 = vector.load %arg6[%c0_14, %c0_15, %c0_16] : memref<1x32x8xf32, #tpu.memory_space<vmem>>, vector<1x32x8xf32>
    tpu.vector_store %arg6[%c0_14, %c0_15, %c0_16], %54 {strides = array<i32>} : memref<1x32x8xf32, #tpu.memory_space<vmem>>, vector<1x32x8xf32>,
    return
  }
  func.func @transform_0(%arg0: i32, %arg1: i32) -> (i32, i32, i32, i32) {
    %c8_i32 = arith.constant 8 : i32
    %0 = arith.muli %arg1, %c8_i32 : i32
    %c1_i32 = arith.constant 1 : i32
    %1 = arith.subi %0, %c1_i32 : i32
    %c0_i32 = arith.constant 0 : i32
    %2 = arith.maxsi %1, %c0_i32 : i32
    %c0_i32_0 = arith.constant 0 : i32
    %c0_i32_1 = arith.constant 0 : i32
    %c0_i32_2 = arith.constant 0 : i32
    return %arg0, %2, %c0_i32_0, %c0_i32_1 : i32, i32, i32, i32
  }
  func.func @transform_1(%arg0: i32, %arg1: i32) -> (i32, i32, i32, i32) {
    %c0_i32 = arith.constant 0 : i32
    %c0_i32_0 = arith.constant 0 : i32
    %c0_i32_1 = arith.constant 0 : i32
    return %arg0, %arg1, %c0_i32, %c0_i32_0 : i32, i32, i32, i32
  }
  func.func @transform_2(%arg0: i32, %arg1: i32) -> (i32, i32, i32, i32) {
    %c1_i32 = arith.constant 1 : i32
    %0 = arith.addi %arg1, %c1_i32 : i32
    %c8_i32 = arith.constant 8 : i32
    %1 = arith.muli %0, %c8_i32 : i32
    %c15_i32 = arith.constant 15 : i32
    %2 = arith.minsi %1, %c15_i32 : i32
    %c0_i32 = arith.constant 0 : i32
    %c0_i32_0 = arith.constant 0 : i32
    %c0_i32_1 = arith.constant 0 : i32
    return %arg0, %2, %c0_i32, %c0_i32_0 : i32, i32, i32, i32
  }
  func.func @transform_3(%arg0: i32, %arg1: i32) -> (i32, i32) {
    %c0_i32 = arith.constant 0 : i32
    %c0_i32_0 = arith.constant 0 : i32
    %c0_i32_1 = arith.constant 0 : i32
    return %c0_i32, %c0_i32_0 : i32, i32
  }
  func.func @transform_4(%arg0: i32, %arg1: i32) -> (i32, i32, i32) {
    %c0_i32 = arith.constant 0 : i32
    %c0_i32_0 = arith.constant 0 : i32
    return %arg0, %arg1, %c0_i32 : i32, i32, i32
  }
}

</mosaic_0001>

<bundles_post_ra>
// kernel: tpu_custom_call.1
= control target key start
LH: loop header
LB: loop body
LE: loop exit
PB: predicated region body
PF: predicated region fallthrough
CT: control target
= control target key end

     0   :  { %s2672_s15 = smov 0   ;;  %s2674_s16 = smov 0   ;;  %s4427_s0 = inlined_call_operand.vmem [shape: f32[2,16,16,4], index: 0, kind: input, shape index: {}]   ;;  %s4428_s1 = inlined_call_operand.vmem [shape: f32[2,16,16,4], index: 1, kind: input, shape index: {}]   ;;  %s4429_s2 = inlined_call_operand.vmem [shape: f32[2,16,16,4], index: 2, kind: input, shape index: {}]   ;;  %s4430_s3 = inlined_call_operand.vmem [shape: f32[64,8], index: 3, kind: input, shape index: {}]   ;;  %s4431_s4 = inlined_call_operand.vmem [shape: f32[2,64,8], index: 4, kind: output, shape index: {}]  }
   0x1   :  { %s2676_s17 = smov 0   ;;  %s2678_s18 = smov 0  }
   0x2   :  { %s2680_s19 = smov 0  }
   0x3 LB: > { %s23_s20 = sadd.s32 1, %s2621_s17  ;;  %s26_s21 = sadd.s32 1, %s2625_s18  ;;  %s2629_s19 = sphi %s2680_s19, %s14_s19   ;;  %s2625_s18 = sphi %s2678_s18, %s4702_s18   ;;  %s2621_s17 = sphi %s2676_s17, %s4701_s17   ;;  %s2617_s16 = sphi %s2674_s16, %s4700_s16   ;;  %s2613_s15 = sphi %s2672_s15, %s4699_s15  }
   0x4   : > { %p24_p0 = scmp.ge.s32.totalorder %s23_s20, 2  ;;  %p2438_p1 = scmp.ge.s32.totalorder %s2629_s19, 1 }
   0x5   : > { %p248_p2 = scmp.lt.s32.totalorder %s2629_s19, 5 }
   0x6   : > { %s4704_s20 = smov (%p24_p0, %s23_s20), 0  ;;  %s4706_s21 = smov (!%p24_p0, %s26_s21), %s2625_s18 }
   0x7   : > { %p249_p3 = pnand %p2438_p1, %p248_p2  ;;  %p28_p4 = scmp.ge.s32.totalorder %s4706_s21, 2 }
   0x9   : > { %s4708_s21 = smov (%p28_p4, %s4706_s21), 0  ;;  %252 = sbr.rel (%p249_p3) target bundleno = 554 (0x22a), region = 36 }
  0x10   : > { %s2705_s22 = sshll.u32 %s2613_s15, 3  ;;  %p313_p5 = scmp.lt.s32.totalorder %s2617_s16, 1  ;;  %v2631_v0 = vmov 1983009808   ;;  %v519_v2 = vlaneseq  ;;  %vm416_vm0 = vcmask 1040384   ;;  %vm1053_vm1 = vcmask 1041409  }
  0x11   : > { %p329_p6 = scmp.lt.s32.totalorder %s2705_s22, 15  ;;  %v517_v1 = vunpack.c.l.s4 %v2631_v0  ;;  %vm1055_vm2 = vcmask 1042434   ;;  %vm1057_vm3 = vcmask 1043459   ;;  %vm1059_vm4 = vcmask 1044484   ;;  %s2476_s5 = sadd.s32 8, %s2705_s22 }
  0x12   : > { %s4710_s16 = smov (!%p313_p5, %s2617_s16), 1  ;;  %v520_v4 = vshrl.u32 %v519_v2, 7  ;;  %vm1061_vm5 = vcmask 1045509   ;;  %vm1063_vm6 = vcmask 1046534   ;;  %vm1065_vm7 = vcmask 1047559   ;;  %p2873_p7 = scmp.lt.s32.totalorder %s2476_s5, 15 }
  0x13   : > { %s330_s23 = scalar_select %p329_p6, %s2705_s22, 15  ;;  %v518_v3 = vunpack.c.0.s8 %v517_v1  ;;  %vm2116_vm8 = vcmask 31744   ;;  %vm2121_vm9 = vcmask 64512   ;;  %vm2126_vm10 = vcmask 97280  }
  0x14   : > { %s2712_s24 = sshll.u32 %s4710_s16, 5  ;;  %v2726_v8 = vsub.s32 0, %v520_v4  ;;  %v2737_v16 = vsub.s32 1, %v520_v4  ;;  %s4712_s5 = smov (!%p2873_p7, %s2476_s5), 15  ;;  %vm2131_vm11 = vcmask 130048   ;;  %vm2136_vm12 = vcmask 162816  }
  0x15   : > { %s2450_s25 = sshll.u32 %s330_s23, 1  ;;  %v2724_v7 = vsub.s32 %v518_v3, %v520_v4  ;;  %s2632_s7 = smov 4   ;;  %vm2141_vm13 = vcmask 195584   ;;  %vm2146_vm14 = vcmask 228352   ;;  %vm2151_vm15 = vcmask 261120  }
  0x16   : > { %s333_s26 = sadd.s32 %s2450_s25, %s2712_s24  ;;  %s4714_s5 = smov (!%p2873_p7, %s4712_s5), 15 }
  0x17   : > { %s2452_s27 = sshll.u32 %s333_s26, 3  ;;  %s2946_s8 = sshll.u32 %s4714_s5, 1 }
  0x18   : > { %s2718_s30 = scalar_lea.vmem %s4428_s1, %s2452_s27  ;;  %s347_s9 = sadd.s32 %s2946_s8, %s2712_s24 }
  0x19   : > { %v386_v5 = vld [vmem:[%s2718_s30 + $0x30] sm:$0xff]  ;;  %v2722_v6 = vld [vmem:[%s2718_s30 + $0x38] sm:$0xff]  ;;  %v2742_v20 = vld [vmem:[%s2718_s30] sm:$0xff]  ;;  %s3147_s10 = sadd.s32 4294967295, %s2705_s22  ;;  %s2633_s11 = smov 16  }
  0x1a   : > { %v382_v9 = vld [vmem:[%s2718_s30 + $0x10] sm:$0xff]  ;;  %v429_v10 = vrot.slane %v386_v5, 7  ;;  %v4434_v11 = vrot.slane %v2722_v6, 7  ;;  %v2731_v12 = vld [vmem:[%s2718_s30 + $0x18] sm:$0xff]  ;;  %v420_v24 = vrot.slane %v2742_v20, 7  ;;  %v2887_v5 = vld [vmem:[%s2718_s30 + $0x8] sm:$0xff] }
  0x1b   : > { %v423_v13 = vrot.slane %v382_v9, 7  ;;  %v390_v14 = vld [vmem:[%s2718_s30 + $0x50] sm:$0xff]  ;;  %v2735_v15 = vld [vmem:[%s2718_s30 + $0x58] sm:$0xff]  ;;  %v4433_v17 = vrot.slane %v2731_v12, 7  ;;  %4526 = vst [vmem:[#allocation6_spill] sm:$0xff] %v2887_v5  ;;  %p311_p8 = scmp.gt.s32.totalorder %s3147_s10, 0 }
  0x1c   : > { %v435_v18 = vrot.slane %v390_v14, 7  ;;  %v4432_v19 = vrot.slane %v2735_v15, 7  ;;  %v431_v21 = vsel %vm416_vm0, %v429_v10, %v4434_v11  ;;  %v471_v22 = vsel %vm416_vm0, 0.0, %v429_v10  ;;  %p2441_p9 = scmp.lt.s32.totalorder %s3147_s10, 15  ;;  %p366_p10 = scmp.gt.s32.totalorder %s2613_s15, 0 }
  0x1d   : > { %v469_v23 = vsel %vm416_vm0, 0.0, %v423_v13  ;;  %v679_v25 = vcombine.high %v471_v22, %v471_v22  ;;  %v2751_v26 = vrot.slane %v471_v22, %v2724_v7  ;;  %v696_v27 = vcombine.high %v431_v21, %v431_v21  ;;  %s312_s12 = scalar_select %p311_p8, %s3147_s10, 0 }
  0x1e   : > { %v2754_v28 = vrot.slane %v431_v21, %v2724_v7  ;;  %v425_v29 = vsel %vm416_vm0, %v423_v13, %v4433_v17  ;;  %v597_v30 = vcombine.high %v469_v23, %v469_v23  ;;  %v2760_v31 = vrot.slane %v469_v23, %v2724_v7  ;;  %s2634_s14 = smov 8   ;;  %s2635_s5 = smov 12  }
  0x1f   : > { %4521 = vst [vmem:[#allocation2_spill] sm:$0xff] %v2751_v26  ;;  %v437_v32 = vsel %vm416_vm0, %v435_v18, %v4432_v19  ;;  %v2766_v33 = vrot.slane %v679_v25, %v2724_v7  ;;  %v2770_v34 = vcombine.high %v2751_v26, %v2751_v26  ;;  %v2773_v35 = vrot.slane %v696_v27, %v2724_v7  ;;  %s4716_s12 = smov (!%p2441_p9, %s312_s12), 15  ;;  %s2636_s6 = smov 20  }
  0x20   : > { %4522 = vst [vmem:[#allocation3_spill] sm:$0xff] %v2760_v31  ;;  %v2777_v36 = vcombine.high %v2754_v28, %v2754_v28  ;;  %v1159_v37 = vrot.slane %v2751_v26, %v2737_v16  ;;  %v2783_v38 = vrot.slane %v2754_v28, %v2737_v16  ;;  %v2786_v39 = vrot.slane %v597_v30, %v2724_v7  ;;  %s2446_s13 = sshll.u32 %s4716_s12, 1  ;;  %s2638_s10 = smov 28  }
  0x21   : > { %v2790_v40 = vcombine.high %v2760_v31, %v2760_v31  ;;  %v2794_v41 = vcombine.high %v2766_v33, %v2766_v33  ;;  %v2798_v42 = vcombine.high %v2773_v35, %v2773_v35  ;;  %v2802_v43 = vrot.slane %v2770_v34, %v2737_v16  ;;  %s3387_s22 = sadd.s32 %s2712_s24, %s2446_s13  ;;  %p374_p11 = scmp.lt.s32.totalorder %s2613_s15, 1 }
  0x22   : > { %v2806_v44 = vrot.slane %v2766_v33, %v2737_v16  ;;  %v2810_v45 = vrot.slane %v2777_v36, %v2737_v16  ;;  %v2814_v46 = vrot.slane %v2773_v35, %v2737_v16  ;;  %v2818_v47 = vcombine.high %v2786_v39, %v2786_v39  ;;  %s3414_s23 = scalar_select %p366_p10, 1, 0 }
  0x23   : > { %v614_v48 = vcombine.high %v425_v29, %v425_v29  ;;  %v2822_v49 = vrot.slane %v2794_v41, %v2737_v16  ;;  %v2826_v50 = vrot.slane %v2798_v42, %v2737_v16  ;;  %v1234_v51 = vsel %vm1053_vm1, %v2802_v43, %v1159_v37  ;;  %s2448_s25 = sshll.u32 %s3387_s22, 3  ;;  %s2459_s12 = sshll.u32 %s347_s9, 3 }
  0x24   : > { %4523 = vst [vmem:[#allocation4_spill] sm:$0xff] %v2814_v46  ;;  %v2831_v52 = vrot.slane %v425_v29, %v2724_v7  ;;  %v1235_v53 = vsel %vm1055_vm2, %v2806_v44, %v1234_v51  ;;  %v1127_v55 = vrot.slane %v2760_v31, %v2737_v16  ;;  %v2842_v56 = vrot.slane %v2790_v40, %v2737_v16  ;;  %s321_s28 = scalar_lea.vmem %s4427_s0, %s2448_s25  ;;  %s368_s29 = scvt.s32.f32 %s3414_s23 }
  0x25   : > { %4524 = vst [vmem:[#allocation5_spill] sm:$0xff] %v2826_v50  ;;  %v2836_v54 = vrot.slane %v614_v48, %v2724_v7  ;;  %v1236_v57 = vsel %vm1057_vm3, %v2822_v49, %v1235_v53  ;;  %v2852_v59 = vrot.slane %v2786_v39, %v2737_v16  ;;  %v2856_v60 = vrot.slane %v2818_v47, %v2737_v16  ;;  %s349_s9 = scalar_lea.vmem %s4429_s2, %s2459_s12  ;;  %s2641_s22 = smov 40  }
  0x26   : > { %v2848_v58 = vcombine.high %v2831_v52, %v2831_v52  ;;  %v1237_v61 = vsel %vm1059_vm4, %v2783_v38, %v1236_v57  ;;  %v2867_v63 = vrot.slane %v2831_v52, %v2737_v16  ;;  %v1227_v3 = vsel %vm1053_vm1, %v2842_v56, %v1127_v55  ;;  %s2642_s23 = smov 44   ;;  %s2644_s8 = smov 52  }
  0x27   : > { %v2863_v62 = vcombine.high %v2836_v54, %v2836_v54  ;;  %v2871_v0 = vrot.slane %v2836_v54, %v2737_v16  ;;  %v1238_v1 = vsel %vm1061_vm5, %v2810_v45, %v1237_v61  ;;  %v473_v4 = vsel %vm416_vm0, 0.0, %v435_v18  ;;  %s2646_s25 = smov 60   ;;  %s2460_s26 = sshll.u32 %s2613_s15, 2 }
  0x28   : > { %v2881_v2 = vrot.slane %v2848_v58, %v2737_v16  ;;  %v1239_v9 = vsel %vm1063_vm6, %v2814_v46, %v1238_v1  ;;  %v1228_v13 = vsel %vm1055_vm2, %v2852_v59, %v1227_v3  ;;  %v761_v14 = vcombine.high %v473_v4, %v473_v4  ;;  %p357_p12 = scmp.lt.s32.totalorder %s2460_s26, 7  ;;  %s2461_s27 = sshll.u32 %s4710_s16, 3 }
  0x29   : > { %v2893_v10 = vrot.slane %v2863_v62, %v2737_v16  ;;  %v2901_v21 = vsel %vm1065_vm7, %v2826_v50, %v1239_v9  ;;  %v1229_v18 = vsel %vm1057_vm3, %v2856_v60, %v1228_v13  ;;  %v2906_v22 = vrot.slane %v473_v4, %v2724_v7 }
  0x2a   : > { %4527 = vst [vmem:[#allocation7_spill] sm:$0xff] %v2901_v21  ;;  %v778_v23 = vcombine.high %v437_v32, %v437_v32  ;;  %1252 = vrot.lane.b32.xlu0 %v2901_v21, %s2632_s7  ;;  %v1230_v25 = vsel %vm1059_vm4, %v2867_v63, %v1229_v18  ;;  %v2913_v27 = vrot.slane %v761_v14, %v2724_v7  ;;  %v4437_v30 = vrot.slane %v2887_v5, 7  ;;  %s4718_s26 = smov (!%p357_p12, %s2460_s26), 7 }
  0x2b   : > { %4528 = vst [vmem:[#allocation8_spill] sm:$0xff] %v2906_v22  ;;  %v2916_v29 = vrot.slane %v437_v32, %v2724_v7  ;;  %v1231_v37 = vsel %vm1061_vm5, %v2881_v2, %v1230_v25  ;;  %v2925_v48 = vcombine.high %v2906_v22, %v2906_v22  ;;  %v1191_v53 = vrot.slane %v2906_v22, %v2737_v16  ;;  %v388_v25 = vld [vmem:[%s2718_s30 + $0x40] sm:$0xff] }
  0x2c   : > { %v2928_v51 = vrot.slane %v778_v23, %v2724_v7  ;;  %v1232_v32 = vsel %vm1063_vm6, %v2871_v0, %v1231_v37  ;;  %v2936_v55 = vcombine.high %v2913_v27, %v2913_v27  ;;  %v2944_v61 = vrot.slane %v2913_v27, %v2737_v16  ;;  %v2987_v37 = vld [vmem:[%s2718_s30 + $0x48] sm:$0xff] }
  0x2d   : > { %v2940_v57 = vcombine.high %v2916_v29, %v2916_v29  ;;  %v2950_v1 = vsel %vm1065_vm7, %v2893_v10, %v1232_v32  ;;  %v2958_v4 = vrot.slane %v2925_v48, %v2737_v16  ;;  %v2962_v9 = vrot.slane %v2916_v29, %v2737_v16  ;;  %4536 = vst [vmem:[#allocation16_spill] sm:$0xff] %v2987_v37 }
  0x2e   : > { %4529 = vst [vmem:[#allocation9_spill] sm:$0xff] %v2944_v61  ;;  %4530 = vst [vmem:[#allocation10_spill] sm:$0xff] %v2950_v1  ;;  %v2954_v3 = vcombine.high %v2928_v51, %v2928_v51  ;;  %1250 = vrot.lane.b32.xlu1 %v2950_v1, %s2632_s7  ;;  %v2970_v13 = vrot.slane %v2936_v55, %v2737_v16  ;;  %v2978_v18 = vrot.slane %v2928_v51, %v2737_v16 }
  0x2f   : > { %4531 = vst [vmem:[#allocation11_spill] sm:$0xff] %v2958_v4  ;;  %4532 = vst [vmem:[#allocation12_spill] sm:$0xff] %v2962_v9  ;;  %v2974_v14 = vrot.slane %v2940_v57, %v2737_v16  ;;  %v422_v23 = vsel %vm416_vm0, %v420_v24, %v4437_v30  ;;  %v1241_v19 = vsel %vm1053_vm1, %v2958_v4, %v1191_v53  ;;  %v468_v17 = vsel %vm416_vm0, 0.0, %v420_v24 }
  0x30   : > { %4533 = vst [vmem:[#allocation13_spill] sm:$0xff] %v2970_v13  ;;  %4535 = vst [vmem:[#allocation15_spill] sm:$0xff] %v2978_v18  ;;  %v2991_v32 = vrot.slane %v2954_v3, %v2737_v16  ;;  %v573_v11 = vcombine.high %v422_v23, %v422_v23  ;;  %v1242_v21 = vsel %vm1055_vm2, %v2944_v61, %v1241_v19  ;;  %v432_v20 = vrot.slane %v388_v25, 7  ;;  %v3069_v61 = vld [vmem:[%s2718_s30 + $0x28] sm:$0xff] }
  0x31   : > { %4534 = vst [vmem:[#allocation14_spill] sm:$0xff] %v2974_v14  ;;  %v556_v1 = vcombine.high %v468_v17, %v468_v17  ;;  %v3001_v30 = vrot.slane %v468_v17, %v2724_v7  ;;  %v3004_v26 = vrot.slane %v422_v23, %v2724_v7  ;;  %v1243_v31 = vsel %vm1057_vm3, %v2970_v13, %v1242_v21  ;;  %v384_v13 = vld [vmem:[%s2718_s30 + $0x20] sm:$0xff] }
  0x32   : > { %4537 = vst [vmem:[#allocation17_spill] sm:$0xff] %v2991_v32  ;;  %v3009_v53 = vrot.slane %v573_v11, %v2724_v7  ;;  %v1244_v22 = vsel %vm1059_vm4, %v2962_v9, %v1243_v31  ;;  %4550 = vst [vmem:[#allocation30_spill] sm:$0xff] %v3069_v61  ;;  %v4552_v4 = vrot.slane %v2987_v37, 7 }
  0x33   : > { %4538 = vst [vmem:[#allocation18_spill] sm:$0xff] %v3004_v26  ;;  %v3015_v19 = vrot.slane %v556_v1, %v2724_v7  ;;  %v3019_v17 = vcombine.high %v3001_v30, %v3001_v30  ;;  %v3023_v21 = vcombine.high %v3004_v26, %v3004_v26  ;;  %v1245_v11 = vsel %vm1061_vm5, %v2974_v14, %v1244_v22 }
  0x34   : > { %4539 = vst [vmem:[#allocation19_spill] sm:$0xff] %v3009_v53  ;;  %v3029_v23 = vcombine.high %v3009_v53, %v3009_v53  ;;  %v1375_v31 = vrot.slane %v3001_v30, %v2726_v8  ;;  %v3035_v1 = vrot.slane %v3004_v26, %v2726_v8  ;;  %v1246_v25 = vsel %vm1063_vm6, %v2978_v18, %v1245_v11 }
  0x35   : > { %4540 = vst [vmem:[#allocation20_spill] sm:$0xff] %v3023_v21  ;;  %v3041_v24 = vcombine.high %v3015_v19, %v3015_v19  ;;  %v3045_v22 = vrot.slane %v3019_v17, %v2726_v8  ;;  %v3049_v5 = vrot.slane %v3015_v19, %v2726_v8  ;;  %v3053_v14 = vsel %vm1065_vm7, %v2991_v32, %v1246_v25 }
  0x36   : > { %4541 = vst [vmem:[#allocation21_spill] sm:$0xff] %v3029_v23  ;;  %4542 = vst [vmem:[#allocation22_spill] sm:$0xff] %v3035_v1  ;;  %v3057_v9 = vrot.slane %v3023_v21, %v2726_v8  ;;  %v3061_v11 = vrot.slane %v3009_v53, %v2726_v8  ;;  %v3065_v18 = vrot.slane %v3029_v23, %v2726_v8  ;;  %1254 = vrot.lane.b32.xlu1 %v3053_v14, %s2632_s7 }
  0x37   : > { %4543 = vst [vmem:[#allocation23_spill] sm:$0xff] %v3041_v24  ;;  %4544 = vst [vmem:[#allocation24_spill] sm:$0xff] %v3045_v22  ;;  %v3075_v25 = vrot.slane %v3041_v24, %v2726_v8  ;;  %v1500_v32 = vsel %vm1053_vm1, %v3045_v22, %v1375_v31  ;;  %v434_v53 = vsel %vm416_vm0, %v432_v20, %v4552_v4  ;;  %v472_v23 = vsel %vm416_vm0, 0.0, %v432_v20 }
  0x38   : > { %4545 = vst [vmem:[#allocation25_spill] sm:$0xff] %v3049_v5  ;;  %4546 = vst [vmem:[#allocation26_spill] sm:$0xff] %v3053_v14  ;;  %v1501_v21 = vsel %vm1055_vm2, %v3049_v5, %v1500_v32  ;;  %v720_v26 = vcombine.high %v472_v23, %v472_v23  ;;  %v3086_v50 = vrot.slane %v472_v23, %v2724_v7  ;;  %v426_v31 = vrot.slane %v384_v13, 7 }
  0x39   : > { %4547 = vst [vmem:[#allocation27_spill] sm:$0xff] %v3057_v9  ;;  %4548 = vst [vmem:[#allocation28_spill] sm:$0xff] %v3061_v11  ;;  %v737_v14 = vcombine.high %v434_v53, %v434_v53  ;;  %v1502_v24 = vsel %vm1057_vm3, %v3075_v25, %v1501_v21  ;;  %v3091_v46 = vrot.slane %v434_v53, %v2724_v7  ;;  %v4565_v5 = vrot.slane %v3069_v61, 7 }
  0x3a   : > { %4549 = vst [vmem:[#allocation29_spill] sm:$0xff] %v3065_v18  ;;  %4551 = vst [vmem:[#allocation31_spill] sm:$0xff] %v3075_v25  ;;  %v1503_v4 = vsel %vm1059_vm4, %v3035_v1, %v1502_v24  ;;  %v3097_v32 = vrot.slane %v720_v26, %v2724_v7  ;;  %v3101_v20 = vcombine.high %v3086_v50, %v3086_v50  ;;  %v4566_v61 = vrot.slane %v2722_v6, 7 }
  0x3b   : > { %4553 = vst [vmem:[#allocation32_spill] sm:$0xff] %v3091_v46  ;;  %v3104_v23 = vrot.slane %v737_v14, %v2724_v7  ;;  %v1504_v53 = vsel %vm1061_vm5, %v3057_v9, %v1503_v4  ;;  %v3110_v13 = vcombine.high %v3091_v46, %v3091_v46  ;;  %v1439_v24 = vrot.slane %v3086_v50, %v2726_v8 }
  0x3c   : > { %v3116_v26 = vrot.slane %v3091_v46, %v2726_v8  ;;  %v1505_v21 = vsel %vm1063_vm6, %v3061_v11, %v1504_v53  ;;  %v3122_v14 = vcombine.high %v3097_v32, %v3097_v32  ;;  %v3130_v22 = vrot.slane %v3101_v20, %v2726_v8 }
  0x3d   : > { %4554 = vst [vmem:[#allocation33_spill] sm:$0xff] %v3104_v23  ;;  %4555 = vst [vmem:[#allocation34_spill] sm:$0xff] %v3110_v13  ;;  %v3126_v4 = vcombine.high %v3104_v23, %v3104_v23  ;;  %v1506_v9 = vsel %vm1065_vm7, %v3065_v18, %v1505_v21  ;;  %v3136_v1 = vrot.slane %v3097_v32, %v2726_v8 }
  0x3e   : > { %4556 = vst [vmem:[#allocation35_spill] sm:$0xff] %v3116_v26  ;;  %4557 = vst [vmem:[#allocation36_spill] sm:$0xff] %v3122_v14  ;;  %v3140_v53 = vrot.slane %v3110_v13, %v2726_v8  ;;  %v3144_v11 = vrot.slane %v3104_v23, %v2726_v8  ;;  %1528 = vrot.lane.b32.xlu0 %v1506_v9, %s2633_s11  ;;  %v3152_v21 = vrot.slane %v3122_v14, %v2726_v8 }
  0x3f   : > { %4558 = vst [vmem:[#allocation37_spill] sm:$0xff] %v3126_v4  ;;  %4559 = vst [vmem:[#allocation38_spill] sm:$0xff] %v3130_v22  ;;  %v3156_v18 = vrot.slane %v3126_v4, %v2726_v8  ;;  %v1514_v25 = vsel %vm1053_vm1, %v3130_v22, %v1439_v24  ;;  %v428_v37 = vsel %vm416_vm0, %v426_v31, %v4565_v5  ;;  %v470_v9 = vsel %vm416_vm0, 0.0, %v426_v31 }
  0x40   : > { %4560 = vst [vmem:[#allocation39_spill] sm:$0xff] %v3136_v1  ;;  %4561 = vst [vmem:[#allocation40_spill] sm:$0xff] %v3140_v53  ;;  %v1515_v23 = vsel %vm1055_vm2, %v3136_v1, %v1514_v25  ;;  %v655_v13 = vcombine.high %v428_v37, %v428_v37  ;;  %v3167_v46 = vrot.slane %v428_v37, %v2724_v7  ;;  %v481_v5 = vsel %vm416_vm0, %v4566_v61, 0.0 }
  0x41   : > { %4562 = vst [vmem:[#allocation41_spill] sm:$0xff] %v3144_v11  ;;  %4563 = vst [vmem:[#allocation42_spill] sm:$0xff] %v3152_v21  ;;  %v1516_v4 = vsel %vm1057_vm3, %v3152_v21, %v1515_v23  ;;  %v638_v14 = vcombine.high %v470_v9, %v470_v9  ;;  %v3172_v24 = vrot.slane %v470_v9, %v2724_v7 }
  0x42   : > { %4564 = vst [vmem:[#allocation43_spill] sm:$0xff] %v3156_v18  ;;  %v1517_v25 = vsel %vm1059_vm4, %v3116_v26, %v1516_v4  ;;  %v3181_v31 = vrot.slane %v655_v13, %v2724_v7  ;;  %v3185_v37 = vcombine.high %v3167_v46, %v3167_v46  ;;  %v3189_v23 = vrot.slane %v3167_v46, %v2726_v8 }
  0x43   : > { %v1518_v6 = vsel %vm1061_vm5, %v3140_v53, %v1517_v25  ;;  %v3194_v61 = vrot.slane %v638_v14, %v2724_v7  ;;  %v3198_v13 = vcombine.high %v3172_v24, %v3172_v24  ;;  %v1407_v4 = vrot.slane %v3172_v24, %v2726_v8 }
  0x44   : > { %4567 = vst [vmem:[#allocation44_spill] sm:$0xff] %v3181_v31  ;;  %4568 = vst [vmem:[#allocation45_spill] sm:$0xff] %v3185_v37  ;;  %v1519_v9 = vsel %vm1063_vm6, %v3144_v11, %v1518_v6  ;;  %v3206_v26 = vcombine.high %v3181_v31, %v3181_v31  ;;  %v3210_v25 = vrot.slane %v3185_v37, %v2726_v8 }
  0x45   : > { %v3214_v14 = vrot.slane %v3181_v31, %v2726_v8  ;;  %v3219_v53 = vsel %vm1065_vm7, %v3156_v18, %v1519_v9  ;;  %v3223_v6 = vcombine.high %v3194_v61, %v3194_v61  ;;  %v3227_v11 = vrot.slane %v3198_v13, %v2726_v8 }
  0x46   : > { %4569 = vst [vmem:[#allocation46_spill] sm:$0xff] %v3206_v26  ;;  %4570 = vst [vmem:[#allocation47_spill] sm:$0xff] %v3219_v53  ;;  %v3231_v21 = vrot.slane %v3194_v61, %v2726_v8  ;;  %1532 = vrot.lane.b32.xlu1 %v3219_v53, %s2633_s11  ;;  %v3240_v9 = vrot.slane %v3206_v26, %v2726_v8  ;;  %v3243_v18 = vrot.slane %v481_v5, %v2724_v7 }
  0x47   : > { %v3247_v1 = vrot.slane %v2770_v34, %v2726_v8  ;;  %v3251_v22 = vrot.slane %v2766_v33, %v2726_v8  ;;  %v3255_v31 = vrot.slane %v3223_v6, %v2726_v8  ;;  %v1507_v53 = vsel %vm1053_vm1, %v3227_v11, %v1407_v4 }
  0x48   : > { %4571 = vst [vmem:[#allocation48_spill] sm:$0xff] %v3231_v21  ;;  %v3261_v26 = vrot.slane %v2794_v41, %v2726_v8  ;;  %v3265_v5 = vrot.slane %v2754_v28, %v2726_v8  ;;  %v1508_v34 = vsel %vm1055_vm2, %v3231_v21, %v1507_v53  ;;  %v3271_v33 = vrot.slane %v2777_v36, %v2726_v8 }
  0x49   : > { %4572 = vst [vmem:[#allocation49_spill] sm:$0xff] %v3247_v1  ;;  %4573 = vst [vmem:[#allocation50_spill] sm:$0xff] %v3251_v22  ;;  %v3275_v37 = vrot.slane %v2773_v35, %v2726_v8  ;;  %v3279_v4 = vrot.slane %v2798_v42, %v2726_v8  ;;  %v1509_v41 = vsel %vm1057_vm3, %v3255_v31, %v1508_v34  ;;  %v4579_v36 = vrot.slane %v2731_v12, 7 }
  0x4a   : > { %4574 = vst [vmem:[#allocation51_spill] sm:$0xff] %v3261_v26  ;;  %4575 = vst [vmem:[#allocation52_spill] sm:$0xff] %v3265_v5  ;;  %v1271_v28 = vrot.slane %v3243_v18, %v2726_v8  ;;  %v1290_v53 = vsel %vm1053_vm1, %v3251_v22, %v3247_v1  ;;  %v1510_v35 = vsel %vm1059_vm4, %v3189_v23, %v1509_v41 }
  0x4b   : > { %4576 = vst [vmem:[#allocation53_spill] sm:$0xff] %v3271_v33  ;;  %4577 = vst [vmem:[#allocation54_spill] sm:$0xff] %v3275_v37  ;;  %v479_v21 = vsel %vm416_vm0, %v4579_v36, 0.0  ;;  %v1291_v42 = vsel %vm1055_vm2, %v3261_v26, %v1290_v53  ;;  %v3304_v22 = vrot.slane %v2790_v40, %v2726_v8  ;;  %v1511_v12 = vsel %vm1061_vm5, %v3210_v25, %v1510_v35 }
  0x4c   : > { %4578 = vst [vmem:[#allocation55_spill] sm:$0xff] %v3279_v4  ;;  %v3300_v34 = vrot.slane %v479_v21, %v2724_v7  ;;  %v1292_v36 = vsel %vm1057_vm3, %v3265_v5, %v1291_v42  ;;  %v3312_v41 = vrot.slane %v2786_v39, %v2726_v8  ;;  %v3316_v53 = vrot.slane %v2818_v47, %v2726_v8 }
  0x4d   : > { %4580 = vst [vmem:[#allocation56_spill] sm:$0xff] %v3304_v22  ;;  %v1512_v21 = vsel %vm1063_vm6, %v3214_v14, %v1511_v12  ;;  %v1293_v40 = vsel %vm1059_vm4, %v3271_v33, %v1292_v36  ;;  %v3324_v35 = vrot.slane %v2831_v52, %v2726_v8  ;;  %v3328_v42 = vrot.slane %v2848_v58, %v2726_v8 }
  0x4e   : > { %4581 = vst [vmem:[#allocation57_spill] sm:$0xff] %v3312_v41  ;;  %4582 = vst [vmem:[#allocation58_spill] sm:$0xff] %v3316_v53  ;;  %v3332_v39 = vsel %vm1065_vm7, %v3240_v9, %v1512_v21  ;;  %v1294_v47 = vsel %vm1061_vm5, %v3275_v37, %v1293_v40  ;;  %v3338_v12 = vrot.slane %v2836_v54, %v2726_v8  ;;  %v4588_v21 = vrot.slane %v2735_v15, 7 }
  0x4f   : > { %4583 = vst [vmem:[#allocation59_spill] sm:$0xff] %v3324_v35  ;;  %4584 = vst [vmem:[#allocation60_spill] sm:$0xff] %v3328_v42  ;;  %v3342_v36 = vrot.slane %v2863_v62, %v2726_v8  ;;  %1530 = vrot.lane.b32.xlu0 %v3332_v39, %s2633_s11  ;;  %v1295_v52 = vsel %vm1063_vm6, %v3279_v4, %v1294_v47  ;;  %v1267_v58 = vrot.slane %v3300_v34, %v2726_v8 }
  0x50   : > { %4585 = vst [vmem:[#allocation61_spill] sm:$0xff] %v3332_v39  ;;  %4586 = vst [vmem:[#allocation62_spill] sm:$0xff] %v3338_v12  ;;  %v1283_v54 = vsel %vm1053_vm1, %v3312_v41, %v3304_v22  ;;  %v483_v62 = vsel %vm416_vm0, %v4588_v21, 0.0  ;;  %v3359_v40 = vsel %vm1065_vm7, %v1271_v28, %v1295_v52  ;;  %v3368_v4 = vrot.slane %v2925_v48, %v2726_v8 }
  0x51   : > { %4587 = vst [vmem:[#allocation63_spill] sm:$0xff] %v3342_v36  ;;  %4589 = vst [vmem:[#allocation64_spill] sm:$0xff] %v3359_v40  ;;  %v1284_v39 = vsel %vm1055_vm2, %v3316_v53, %v1283_v54  ;;  %v3364_v47 = vrot.slane %v483_v62, %v2724_v7  ;;  %1308 = vrot.lane.b32.xlu1 %v3359_v40, %s2634_s14  ;;  %v3376_v28 = vrot.slane %v2913_v27, %v2726_v8 }
  0x52   : > { %4590 = vst [vmem:[#allocation65_spill] sm:$0xff] %v3368_v4  ;;  %v1285_v15 = vsel %vm1057_vm3, %v3324_v35, %v1284_v39  ;;  %v3380_v52 = vrot.slane %v2936_v55, %v2726_v8  ;;  %v3384_v48 = vrot.slane %v2916_v29, %v2726_v8  ;;  %v3393_v39 = vrot.slane %v2940_v57, %v2726_v8 }
  0x53   : > { %4591 = vst [vmem:[#allocation66_spill] sm:$0xff] %v3376_v28  ;;  %v1286_v54 = vsel %vm1059_vm4, %v3328_v42, %v1285_v15  ;;  %v3397_v27 = vrot.slane %v2928_v51, %v2726_v8  ;;  %v3401_v55 = vrot.slane %v2954_v3, %v2726_v8  ;;  %v1275_v21 = vrot.slane %v3364_v47, %v2726_v8 }
  0x54   : > { %4592 = vst [vmem:[#allocation67_spill] sm:$0xff] %v3380_v52  ;;  %4593 = vst [vmem:[#allocation68_spill] sm:$0xff] %v3384_v48  ;;  %v1287_v29 = vsel %vm1061_vm5, %v3338_v12, %v1286_v54  ;;  %v1297_v62 = vsel %vm1053_vm1, %v3376_v28, %v3368_v4  ;;  %v1323_v57 = vrot.slane %v3300_v34, %v2737_v16 }
  0x55   : > { %4594 = vst [vmem:[#allocation69_spill] sm:$0xff] %v3393_v39  ;;  %4595 = vst [vmem:[#allocation70_spill] sm:$0xff] %v3397_v27  ;;  %v1288_v51 = vsel %vm1063_vm6, %v3342_v36, %v1287_v29  ;;  %v1298_v3 = vsel %vm1055_vm2, %v3380_v52, %v1297_v62  ;;  %v1339_v15 = vsel %vm1053_vm1, %v2852_v59, %v2842_v56 }
  0x56   : > { %4596 = vst [vmem:[#allocation71_spill] sm:$0xff] %v3401_v55  ;;  %v1327_v54 = vrot.slane %v3243_v18, %v2737_v16  ;;  %v3427_v40 = vsel %vm1065_vm7, %v1267_v58, %v1288_v51  ;;  %v1299_v34 = vsel %vm1057_vm3, %v3384_v48, %v1298_v3  ;;  %v1340_v29 = vsel %vm1055_vm2, %v2856_v60, %v1339_v15  ;;  %v4599_v3 = vld [vmem:[#allocation4_spill] sm:$0xff] }
  0x57   : > { %4597 = vst [vmem:[#allocation72_spill] sm:$0xff] %v3427_v40  ;;  %v1346_v62 = vsel %vm1053_vm1, %v2806_v44, %v2802_v43  ;;  %1306 = vrot.lane.b32.xlu0 %v3427_v40, %s2634_s14  ;;  %v1300_v56 = vsel %vm1059_vm4, %v3393_v39, %v1299_v34  ;;  %v1341_v59 = vsel %vm1057_vm3, %v2867_v63, %v1340_v29  ;;  %v4613_v40 = vld [vmem:[#allocation14_spill] sm:$0xff] }
  0x58   : > { %v1347_v18 = vsel %vm1055_vm2, %v2822_v49, %v1346_v62  ;;  %v1543_v60 = vrot.slane %v3001_v30, %v2737_v16  ;;  %v1301_v58 = vsel %vm1061_vm5, %v3397_v27, %v1300_v56  ;;  %v1342_v43 = vsel %vm1059_vm4, %v2881_v2, %v1341_v59  ;;  %v4604_v62 = vld [vmem:[#allocation20_spill] sm:$0xff]  ;;  %v364_v59 = vld [vmem:[%s321_s28] sm:$0xff] }
  0x59   : > { %v1348_v44 = vsel %vm1057_vm3, %v2783_v38, %v1347_v18  ;;  %v3454_v51 = vrot.slane %v3019_v17, %v2737_v16  ;;  %v1302_v49 = vsel %vm1063_vm6, %v3401_v55, %v1301_v58  ;;  %v1343_v63 = vsel %vm1061_vm5, %v2871_v0, %v1342_v43  ;;  %v4600_v0 = vld [vmem:[#allocation23_spill] sm:$0xff] }
  0x5a   : > { %v1349_v2 = vsel %vm1059_vm4, %v2810_v45, %v1348_v44  ;;  %v3467_v38 = vrot.slane %v3015_v19, %v2737_v16  ;;  %v3471_v30 = vsel %vm1065_vm7, %v1275_v21, %v1302_v49  ;;  %v1344_v17 = vsel %vm1063_vm6, %v2893_v10, %v1343_v63  ;;  %v4602_v19 = vld [vmem:[#allocation5_spill] sm:$0xff]  ;;  %v4603_v10 = vld [vmem:[#allocation18_spill] sm:$0xff]  ;;  %v365_v18 = vld [vmem:[%s321_s28 + $0x8] sm:$0xff]  ;;  %s360_s28 = sadd.s32 %s2461_s27, %s4718_s26 }
  0x5b   : > { %4598 = vst [vmem:[#allocation73_spill] sm:$0xff] %v3471_v30  ;;  %v1350_v15 = vsel %vm1061_vm5, %v4599_v3, %v1349_v2  ;;  %v3479_v34 = vrot.slane %v4600_v0, %v2737_v16  ;;  %1310 = vrot.lane.b32.xlu1 %v3471_v30, %s2634_s14  ;;  %v3484_v45 = vsel %vm1065_vm7, %v1323_v57, %v1344_v17  ;;  %v4606_v58 = vld [vmem:[#allocation19_spill] sm:$0xff]  ;;  %v4607_v44 = vld [vmem:[#allocation21_spill] sm:$0xff]  ;;  %v392_v2 = vld [vmem:[%s2718_s30 + $0x60] sm:$0xff] }
  0x5c   : > { %4601 = vst [vmem:[#allocation4_spill] sm:$0xff] %v3484_v45  ;;  %v1351_v21 = vsel %vm1063_vm6, %v4602_v19, %v1350_v15  ;;  %v3490_v29 = vrot.slane %v4603_v10, %v2737_v16  ;;  %v3494_v56 = vrot.slane %v4604_v62, %v2737_v16  ;;  %1362 = vrot.lane.b32.xlu0 %v3484_v45, %s2635_s5  ;;  %v3513_v17 = vld [vmem:[%s2718_s30 + $0x68] sm:$0xff]  ;;  %v4610_v0 = vld [vmem:[#allocation9_spill] sm:$0xff] }
  0x5d   : > { %v3499_v57 = vsel %vm1065_vm7, %v1327_v54, %v1351_v21  ;;  %v3503_v43 = vrot.slane %v4606_v58, %v2737_v16  ;;  %v3507_v49 = vrot.slane %v4607_v44, %v2737_v16  ;;  %v1668_v63 = vsel %vm1053_vm1, %v3454_v51, %v1543_v60  ;;  %v4609_v15 = vld [vmem:[#allocation11_spill] sm:$0xff]  ;;  %v4611_v62 = vld [vmem:[#allocation13_spill] sm:$0xff] }
  0x5e   : > { %4605 = vst [vmem:[#allocation23_spill] sm:$0xff] %v3499_v57  ;;  %v1669_v3 = vsel %vm1055_vm2, %v3467_v38, %v1668_v63  ;;  %v1331_v54 = vrot.slane %v3364_v47, %v2737_v16  ;;  %v1353_v19 = vsel %vm1053_vm1, %v4610_v0, %v4609_v15  ;;  %v369_v21 = vstv %s368_s29  ;;  %v4612_v63 = vld [vmem:[#allocation12_spill] sm:$0xff]  ;;  %s2643_s29 = smov 48  }
  0x5f   : > { %4608 = vst [vmem:[#allocation5_spill] sm:$0xff] %v3507_v49  ;;  %v1670_v10 = vsel %vm1057_vm3, %v3479_v34, %v1669_v3  ;;  %v1354_v60 = vsel %vm1055_vm2, %v4611_v62, %v1353_v19  ;;  %v370_v58 = vmul.f32 %v369_v21, %v364_v59  ;;  %v3526_v44 = vmul.f32 %v369_v21, %v365_v18  ;;  %v4614_v62 = vld [vmem:[#allocation15_spill] sm:$0xff] }
  0x60   : > { %1364 = vrot.lane.b32.xlu1 %v3499_v57, %s2635_s5  ;;  %v1671_v47 = vsel %vm1059_vm4, %v3490_v29, %v1670_v10  ;;  %v1355_v45 = vsel %vm1057_vm3, %v4612_v63, %v1354_v60  ;;  %v438_v15 = vrot.slane %v392_v2, 7  ;;  %v4489_v0 = vrot.slane %v3513_v17, 7  ;;  %v4615_v63 = vld [vmem:[#allocation17_spill] sm:$0xff] }
  0x61   : > { %v1672_v3 = vsel %vm1061_vm5, %v3494_v56, %v1671_v47  ;;  %v1356_v59 = vsel %vm1059_vm4, %v4613_v40, %v1355_v45  ;;  %v417_v18 = vrot.slane %v370_v58, 7  ;;  %v418_v19 = vrot.slane %v3526_v44, 7 }
  0x62   : > { %v1673_v21 = vsel %vm1063_vm6, %v3503_v43, %v1672_v3  ;;  %v1357_v10 = vsel %vm1061_vm5, %v4614_v62, %v1356_v59  ;;  %v440_v2 = vsel %vm416_vm0, %v438_v15, %v4489_v0  ;;  %v474_v60 = vsel %vm416_vm0, 0.0, %v438_v15 }
  0x63   : > { %v1674_v47 = vsel %vm1065_vm7, %v3507_v49, %v1673_v21  ;;  %v1358_v40 = vsel %vm1063_vm6, %v4615_v63, %v1357_v10  ;;  %v419_v45 = vsel %vm416_vm0, %v417_v18, %v418_v19  ;;  %v467_v58 = vsel %vm416_vm0, 0.0, %v417_v18 }
  0x64   : > { %1696 = vrot.lane.b32.xlu0 %v1674_v47, %s2636_s6  ;;  %v3556_v44 = vsel %vm1065_vm7, %v1331_v54, %v1358_v40  ;;  %v515_v3 = vcombine.high %v467_v58, %v467_v58  ;;  %v3559_v59 = vrot.slane %v467_v58, %v2724_v7  ;;  %v532_v15 = vcombine.high %v419_v45, %v419_v45 }
  0x65   : > { %4616 = vst [vmem:[#allocation18_spill] sm:$0xff] %v3556_v44  ;;  %1366 = vrot.lane.b32.xlu1 %v3556_v44, %s2635_s5  ;;  %v539_v21 = vrot.slane %v419_v45, %v2724_v7  ;;  %v802_v62 = vcombine.high %v474_v60, %v474_v60  ;;  %v3565_v10 = vrot.slane %v474_v60, %v2724_v7  ;;  %v477_v41 = vsel %vm416_vm0, %v418_v19, 0.0 }
  0x66   : > { %4617 = vst [vmem:[#allocation20_spill] sm:$0xff] %v3559_v59  ;;  %v819_v18 = vcombine.high %v440_v2, %v440_v2  ;;  %v529_v47 = vrot.slane %v515_v3, %v2724_v7  ;;  %v530_v54 = vcombine.high %v3559_v59, %v3559_v59  ;;  %v546_v63 = vrot.slane %v532_v15, %v2724_v7 }
  0x67   : > { %v1095_v40 = vrot.slane %v3559_v59, %v2737_v16  ;;  %v547_v58 = vcombine.high %v539_v21, %v539_v21  ;;  %v3574_v0 = vrot.slane %v539_v21, %v2737_v16  ;;  %v3577_v45 = vrot.slane %v802_v62, %v2724_v7 }
  0x68   : > { %v3581_v60 = vcombine.high %v3565_v10, %v3565_v10  ;;  %v531_v3 = vcombine.high %v529_v47, %v529_v47  ;;  %v548_v57 = vcombine.high %v546_v63, %v546_v63  ;;  %v3584_v44 = vrot.slane %v530_v54, %v2737_v16 }
  0x69   : > { %v1103_v15 = vrot.slane %v529_v47, %v2737_v16  ;;  %v3588_v59 = vrot.slane %v547_v58, %v2737_v16  ;;  %v3591_v30 = vrot.slane %v546_v63, %v2737_v16  ;;  %v3595_v62 = vcombine.high %v3577_v45, %v3577_v45 }
  0x6a   : > { %v3598_v37 = vrot.slane %v440_v2, %v2724_v7  ;;  %v1107_v33 = vrot.slane %v531_v3, %v2737_v16  ;;  %v3602_v5 = vrot.slane %v548_v57, %v2737_v16  ;;  %v1220_v26 = vsel %vm1053_vm1, %v3584_v44, %v1095_v40 }
  0x6b   : > { %v3607_v1 = vrot.slane %v819_v18, %v2724_v7  ;;  %v1221_v36 = vsel %vm1055_vm2, %v1103_v15, %v1220_v26  ;;  %v1471_v2 = vrot.slane %v3565_v10, %v2726_v8  ;;  %v3618_v55 = vrot.slane %v3581_v60, %v2726_v8 }
  0x6c   : > { %v3612_v12 = vcombine.high %v3598_v37, %v3598_v37  ;;  %v1222_v42 = vsel %vm1057_vm3, %v1107_v33, %v1221_v36  ;;  %v3627_v26 = vrot.slane %v3577_v45, %v2726_v8  ;;  %v3631_v18 = vrot.slane %v3595_v62, %v2726_v8 }
  0x6d   : > { %v3623_v40 = vcombine.high %v3607_v1, %v3607_v1  ;;  %v1223_v27 = vsel %vm1059_vm4, %v3574_v0, %v1222_v42  ;;  %v3637_v35 = vrot.slane %v3598_v37, %v2726_v8  ;;  %v3645_v39 = vrot.slane %v3607_v1, %v2726_v8 }
  0x6e   : > { %v3641_v36 = vrot.slane %v3612_v12, %v2726_v8  ;;  %v1224_v53 = vsel %vm1061_vm5, %v3588_v59, %v1223_v27  ;;  %v1521_v42 = vsel %vm1053_vm1, %v3618_v55, %v1471_v2  ;;  %v555_v28 = vrot.slane %v477_v41, %v2724_v7 }
  0x6f   : > { %v3651_v48 = vrot.slane %v3623_v40, %v2726_v8  ;;  %v1225_v52 = vsel %vm1063_vm6, %v3591_v30, %v1224_v53  ;;  %v1522_v22 = vsel %vm1055_vm2, %v3627_v26, %v1521_v42  ;;  %v3662_v4 = vrot.slane %v530_v54, %v2726_v8 }
  0x70   : > { %v1226_v27 = vsel %vm1065_vm7, %v3602_v5, %v1225_v52  ;;  %v1523_v49 = vsel %vm1057_vm3, %v3631_v18, %v1522_v22  ;;  %v3669_v2 = vrot.slane %v529_v47, %v2726_v8  ;;  %v3672_v19 = vrot.slane %v531_v3, %v2726_v8 }
  0x71   : > { %4618 = vst [vmem:[#allocation19_spill] sm:$0xff] %v3662_v4  ;;  %1248 = vrot.lane.b32.xlu0 %v1226_v27, %s2632_s7  ;;  %v1524_v41 = vsel %vm1059_vm4, %v3637_v35, %v1523_v49  ;;  %v3678_v53 = vrot.slane %v539_v21, %v2726_v8  ;;  %v3681_v54 = vrot.slane %v547_v58, %v2726_v8  ;;  %s2637_s7 = smov 24  }
  0x72   : > { %4619 = vst [vmem:[#allocation21_spill] sm:$0xff] %v3669_v2  ;;  %4620 = vst [vmem:[#allocation11_spill] sm:$0xff] %v3672_v19  ;;  %v3684_v52 = vrot.slane %v546_v63, %v2726_v8  ;;  %v1525_v22 = vsel %vm1061_vm5, %v3641_v36, %v1524_v41  ;;  %v3689_v47 = vrot.slane %v548_v57, %v2726_v8 }
  0x73   : > { %4621 = vst [vmem:[#allocation9_spill] sm:$0xff] %v3678_v53  ;;  %4622 = vst [vmem:[#allocation13_spill] sm:$0xff] %v3681_v54  ;;  %v1263_v3 = vrot.slane %v555_v28, %v2726_v8  ;;  %v1276_v49 = vsel %vm1053_vm1, %v3669_v2, %v3662_v4  ;;  %v1526_v21 = vsel %vm1063_vm6, %v3645_v39, %v1525_v22  ;;  %v4625_v22 = vld [vmem:[#allocation36_spill] sm:$0xff]  ;;  %v4629_v2 = vld [vmem:[#allocation37_spill] sm:$0xff] }
  0x74   : > { %4623 = vst [vmem:[#allocation12_spill] sm:$0xff] %v3684_v52  ;;  %4624 = vst [vmem:[#allocation14_spill] sm:$0xff] %v3689_v47  ;;  %v1277_v58 = vsel %vm1055_vm2, %v3672_v19, %v1276_v49  ;;  %v1607_v63 = vrot.slane %v3086_v50, %v2737_v16  ;;  %v3703_v42 = vrot.slane %v3101_v20, %v2737_v16  ;;  %v4626_v20 = vld [vmem:[#allocation32_spill] sm:$0xff] }
  0x75   : > { %v3707_v57 = vsel %vm1065_vm7, %v3651_v48, %v1526_v21  ;;  %v1278_v27 = vsel %vm1057_vm3, %v3678_v53, %v1277_v58  ;;  %v3713_v41 = vrot.slane %v3097_v32, %v2737_v16  ;;  %v3717_v49 = vrot.slane %v4625_v22, %v2737_v16  ;;  %v4627_v58 = vld [vmem:[#allocation34_spill] sm:$0xff]  ;;  %v4628_v32 = vld [vmem:[#allocation33_spill] sm:$0xff] }
  0x76   : > { %1534 = vrot.lane.b32.xlu1 %v3707_v57, %s2633_s11  ;;  %v1279_v50 = vsel %vm1059_vm4, %v3681_v54, %v1278_v27  ;;  %v3725_v21 = vrot.slane %v4626_v20, %v2737_v16  ;;  %v3729_v53 = vrot.slane %v4627_v58, %v2737_v16  ;;  %v3733_v19 = vrot.slane %v4628_v32, %v2737_v16  ;;  %s4116_s11 = scalar_select %p374_p11, 1, 0 }
  0x77   : > { %v1280_v22 = vsel %vm1061_vm5, %v3684_v52, %v1279_v50  ;;  %v3739_v4 = vrot.slane %v4629_v2, %v2737_v16  ;;  %v1682_v27 = vsel %vm1053_vm1, %v3703_v42, %v1607_v63  ;;  %v1319_v20 = vrot.slane %v555_v28, %v2737_v16 }
  0x78   : > { %v1281_v58 = vsel %vm1063_vm6, %v3689_v47, %v1280_v22  ;;  %v1683_v54 = vsel %vm1055_vm2, %v3713_v41, %v1682_v27  ;;  %v1332_v32 = vsel %vm1053_vm1, %v1103_v15, %v3584_v44  ;;  %v1639_v50 = vrot.slane %v3565_v10, %v2737_v16  ;;  %v4647_v47 = vld [vmem:[#allocation31_spill] sm:$0xff]  ;;  %s376_s13 = scvt.s32.f32 %s4116_s11 }
  0x79   : > { %v1282_v2 = vsel %vm1065_vm7, %v1263_v3, %v1281_v58  ;;  %v1684_v52 = vsel %vm1057_vm3, %v3717_v49, %v1683_v54  ;;  %v1333_v63 = vsel %vm1055_vm2, %v1107_v33, %v1332_v32  ;;  %v3758_v28 = vrot.slane %v3581_v60, %v2737_v16 }
  0x7a   : > { %1304 = vrot.lane.b32.xlu0 %v1282_v2, %s2634_s14  ;;  %v1685_v22 = vsel %vm1059_vm4, %v3725_v21, %v1684_v52  ;;  %v1334_v44 = vsel %vm1057_vm3, %v3574_v0, %v1333_v63  ;;  %v3767_v10 = vrot.slane %v3577_v45, %v2737_v16  ;;  %v3771_v15 = vrot.slane %v3595_v62, %v2737_v16  ;;  %v4632_v63 = vld [vmem:[#allocation46_spill] sm:$0xff]  ;;  %s2640_s14 = smov 36  }
  0x7b   : > { %v1686_v33 = vsel %vm1061_vm5, %v3729_v53, %v1685_v22  ;;  %v1335_v60 = vsel %vm1059_vm4, %v3588_v59, %v1334_v44  ;;  %v3779_v54 = vrot.slane %v3598_v37, %v2737_v16  ;;  %v3783_v0 = vrot.slane %v3612_v12, %v2737_v16 }
  0x7c   : > { %v1687_v45 = vsel %vm1063_vm6, %v3733_v19, %v1686_v33  ;;  %v1336_v62 = vsel %vm1061_vm5, %v3591_v30, %v1335_v60  ;;  %v3791_v52 = vrot.slane %v3607_v1, %v2737_v16  ;;  %v3795_v59 = vrot.slane %v3623_v40, %v2737_v16  ;;  %v4633_v33 = vld [vmem:[#allocation16_spill] sm:$0xff] }
  0x7d   : > { %v3799_v37 = vsel %vm1065_vm7, %v3739_v4, %v1687_v45  ;;  %v1337_v12 = vsel %vm1063_vm6, %v3602_v5, %v1336_v62  ;;  %v1689_v3 = vsel %vm1053_vm1, %v3758_v28, %v1639_v50  ;;  %v1575_v30 = vrot.slane %v3172_v24, %v2737_v16  ;;  %v4631_v50 = vld [vmem:[#allocation44_spill] sm:$0xff]  ;;  %v4635_v62 = vld [vmem:[#allocation38_spill] sm:$0xff] }
  0x7e   : > { %1700 = vrot.lane.b32.xlu1 %v3799_v37, %s2636_s6  ;;  %v1338_v1 = vsel %vm1065_vm7, %v1319_v20, %v1337_v12  ;;  %v1690_v40 = vsel %vm1055_vm2, %v3767_v10, %v1689_v3  ;;  %v3814_v27 = vrot.slane %v3198_v13, %v2737_v16  ;;  %v3818_v5 = vrot.slane %v3194_v61, %v2737_v16  ;;  %v4630_v13 = vld [vmem:[#allocation45_spill] sm:$0xff]  ;;  %v4636_v12 = vld [vmem:[#allocation39_spill] sm:$0xff] }
  0x7f   : > { %1360 = vrot.lane.b32.xlu0 %v1338_v1, %s2635_s5  ;;  %v1691_v24 = vsel %vm1057_vm3, %v3771_v15, %v1690_v40  ;;  %v3825_v58 = vrot.slane %v3223_v6, %v2737_v16  ;;  %v3829_v20 = vrot.slane %v3167_v46, %v2737_v16  ;;  %v3833_v32 = vrot.slane %v4630_v13, %v2737_v16 }
  0x80   : > { %v1692_v61 = vsel %vm1059_vm4, %v3779_v54, %v1691_v24  ;;  %v3839_v2 = vrot.slane %v4631_v50, %v2737_v16  ;;  %v3843_v22 = vrot.slane %v4632_v63, %v2737_v16  ;;  %v1675_v6 = vsel %vm1053_vm1, %v3814_v27, %v1575_v30  ;;  %v4637_v24 = vld [vmem:[#allocation42_spill] sm:$0xff]  ;;  %v4638_v63 = vld [vmem:[#allocation35_spill] sm:$0xff] }
  0x81   : > { %v1693_v46 = vsel %vm1061_vm5, %v3783_v0, %v1692_v61  ;;  %v1676_v44 = vsel %vm1055_vm2, %v3818_v5, %v1675_v6  ;;  %v4634_v60 = vrot.slane %v4633_v33, 7  ;;  %v1738_v3 = vsel %vm1053_vm1, %v4636_v12, %v4635_v62  ;;  %v4641_v62 = vld [vmem:[#allocation40_spill] sm:$0xff] }
  0x82   : > { %v1694_v1 = vsel %vm1063_vm6, %v3791_v52, %v1693_v46  ;;  %v1677_v30 = vsel %vm1057_vm3, %v3825_v58, %v1676_v44  ;;  %v1739_v13 = vsel %vm1055_vm2, %v4637_v24, %v1738_v3  ;;  %v4639_v46 = vld [vmem:[#allocation6_spill] sm:$0xff] }
  0x83   : > { %v482_v45 = vsel %vm416_vm0, %v4634_v60, 0.0  ;;  %v3868_v61 = vsel %vm1065_vm7, %v3795_v59, %v1694_v1  ;;  %v1678_v50 = vsel %vm1059_vm4, %v3829_v20, %v1677_v30  ;;  %v1740_v6 = vsel %vm1057_vm3, %v4638_v63, %v1739_v13  ;;  %v4642_v30 = vld [vmem:[#allocation41_spill] sm:$0xff]  ;;  %v4643_v13 = vld [vmem:[#allocation24_spill] sm:$0xff] }
  0x84   : > { %v3862_v40 = vrot.slane %v482_v45, %v2724_v7  ;;  %v4640_v33 = vrot.slane %v4639_v46, 7  ;;  %1702 = vrot.lane.b32.xlu1 %v3868_v61, %s2636_s6  ;;  %v1679_v60 = vsel %vm1061_vm5, %v3833_v32, %v1678_v50  ;;  %v1741_v12 = vsel %vm1059_vm4, %v4641_v62, %v1740_v6  ;;  %v4644_v63 = vld [vmem:[#allocation25_spill] sm:$0xff] }
  0x85   : > { %v1680_v1 = vsel %vm1063_vm6, %v3839_v2, %v1679_v60  ;;  %v1742_v24 = vsel %vm1061_vm5, %v4642_v30, %v1741_v12  ;;  %v1724_v46 = vsel %vm1053_vm1, %v4644_v63, %v4643_v13  ;;  %v4645_v50 = vrot.slane %v3513_v17, 7  ;;  %v4648_v30 = vld [vmem:[#allocation22_spill] sm:$0xff] }
  0x86   : > { %v478_v44 = vsel %vm416_vm0, %v4640_v33, 0.0  ;;  %v1719_v45 = vrot.slane %v3862_v40, %v2726_v8  ;;  %v3900_v6 = vsel %vm1065_vm7, %v3843_v22, %v1680_v1  ;;  %v1725_v12 = vsel %vm1055_vm2, %v4647_v47, %v1724_v46  ;;  %v4649_v47 = vld [vmem:[#allocation27_spill] sm:$0xff]  ;;  %v4650_v46 = vld [vmem:[#allocation30_spill] sm:$0xff] }
  0x87   : > { %v3886_v3 = vrot.slane %v478_v44, %v2724_v7  ;;  %v484_v33 = vsel %vm416_vm0, %v4645_v50, 0.0  ;;  %v4646_v44 = vld [vmem:[#allocation43_spill] sm:$0xff]  ;;  %1698 = vrot.lane.b32.xlu0 %v3900_v6, %s2636_s6  ;;  %v1726_v13 = vsel %vm1057_vm3, %v4648_v30, %v1725_v12  ;;  %v4651_v50 = vrot.slane %v4650_v46, 7  ;;  %v4653_v12 = vld [vmem:[#allocation28_spill] sm:$0xff] }
  0x88   : > { %v1743_v62 = vsel %vm1063_vm6, %v4646_v44, %v1742_v24  ;;  %v3916_v1 = vrot.slane %v484_v33, %v2724_v7  ;;  %v1745_v24 = vsel %vm1053_vm1, %v3627_v26, %v3618_v55  ;;  %v1727_v63 = vsel %vm1059_vm4, %v4649_v47, %v1726_v13  ;;  %v4652_v33 = vld [vmem:[#allocation48_spill] sm:$0xff] }
  0x89   : > { %v1711_v60 = vrot.slane %v3886_v3, %v2726_v8  ;;  %v3911_v17 = vsel %vm1065_vm7, %v1719_v45, %v1743_v62  ;;  %v1746_v45 = vsel %vm1055_vm2, %v3631_v18, %v1745_v24  ;;  %v480_v44 = vsel %vm416_vm0, %v4651_v50, 0.0  ;;  %v4654_v18 = vld [vmem:[#allocation29_spill] sm:$0xff] }
  0x8a   : > { %1756 = vrot.lane.b32.xlu1 %v3911_v17, %s2637_s7  ;;  %v1731_v62 = vsel %vm1053_vm1, %v4652_v33, %v3227_v11  ;;  %v1728_v55 = vsel %vm1061_vm5, %v4653_v12, %v1727_v63  ;;  %v1723_v26 = vrot.slane %v3916_v1, %v2726_v8  ;;  %v1747_v30 = vsel %vm1057_vm3, %v3637_v35, %v1746_v45  ;;  %v4656_v12 = vld [vmem:[#allocation8_spill] sm:$0xff] }
  0x8b   : > { %v3940_v13 = vrot.slane %v480_v44, %v2724_v7  ;;  %v1729_v24 = vsel %vm1063_vm6, %v4654_v18, %v1728_v55  ;;  %v1748_v47 = vsel %vm1059_vm4, %v3641_v36, %v1747_v30  ;;  %v1732_v11 = vsel %vm1055_vm2, %v3255_v31, %v1731_v62  ;;  %v4027_v62 = vld [vmem:[%s2718_s30 + $0x78] sm:$0xff] }
  0x8c   : > { %v1775_v63 = vrot.slane %v3862_v40, %v2737_v16  ;;  %v1730_v46 = vsel %vm1065_vm7, %v1711_v60, %v1729_v24  ;;  %v1749_v35 = vsel %vm1061_vm5, %v3645_v39, %v1748_v47  ;;  %v1733_v50 = vsel %vm1057_vm3, %v3189_v23, %v1732_v11  ;;  %v4659_v11 = vld [vmem:[#allocation66_spill] sm:$0xff] }
  0x8d   : > { %v1715_v45 = vrot.slane %v3940_v13, %v2726_v8  ;;  %1752 = vrot.lane.b32.xlu0 %v1730_v46, %s2637_s7  ;;  %v1750_v36 = vsel %vm1063_vm6, %v3651_v48, %v1749_v35  ;;  %v1734_v31 = vsel %vm1059_vm4, %v3210_v25, %v1733_v50  ;;  %v1794_v40 = vsel %vm1053_vm1, %v3713_v41, %v3703_v42 }
  0x8e   : > { %v1767_v39 = vrot.slane %v3886_v3, %v2737_v16  ;;  %v3968_v60 = vsel %vm1065_vm7, %v1723_v26, %v1750_v36  ;;  %v1735_v23 = vsel %vm1061_vm5, %v3214_v14, %v1734_v31  ;;  %v1795_v44 = vsel %vm1055_vm2, %v3717_v49, %v1794_v40  ;;  %v4657_v26 = vld [vmem:[#allocation3_spill] sm:$0xff]  ;;  %v4662_v36 = vld [vmem:[#allocation57_spill] sm:$0xff]  ;;  %v4663_v40 = vld [vmem:[#allocation68_spill] sm:$0xff] }
  0x8f   : > { %v1780_v25 = vsel %vm1053_vm1, %v3467_v38, %v3454_v51  ;;  %1758 = vrot.lane.b32.xlu1 %v3968_v60, %s2637_s7  ;;  %v1736_v48 = vsel %vm1063_vm6, %v3240_v9, %v1735_v23  ;;  %v1796_v42 = vsel %vm1057_vm3, %v3725_v21, %v1795_v44  ;;  %v1779_v41 = vrot.slane %v3916_v1, %v2737_v16  ;;  %v4664_v23 = vld [vmem:[#allocation58_spill] sm:$0xff] }
  0x90   : > { %v1781_v14 = vsel %vm1055_vm2, %v3479_v34, %v1780_v25  ;;  %v3988_v49 = vsel %vm1065_vm7, %v1715_v45, %v1736_v48  ;;  %v1797_v51 = vsel %vm1059_vm4, %v3729_v53, %v1796_v42  ;;  %v1801_v9 = vsel %vm1053_vm1, %v3767_v10, %v3758_v28  ;;  %v4661_v45 = vld [vmem:[#allocation67_spill] sm:$0xff]  ;;  %v4665_v42 = vld [vmem:[#allocation69_spill] sm:$0xff] }
  0x91   : > { %v1782_v38 = vsel %vm1057_vm3, %v3490_v29, %v1781_v14  ;;  %1754 = vrot.lane.b32.xlu0 %v3988_v49, %s2637_s7  ;;  %v1798_v34 = vsel %vm1061_vm5, %v3733_v19, %v1797_v51  ;;  %v1802_v53 = vsel %vm1055_vm2, %v3771_v15, %v1801_v9  ;;  %v1771_v29 = vrot.slane %v3940_v13, %v2737_v16  ;;  %v4655_v15 = vld [vmem:[#allocation5_spill] sm:$0xff] }
  0x92   : > { %v1783_v21 = vsel %vm1059_vm4, %v3494_v56, %v1782_v38  ;;  %v1799_v3 = vsel %vm1063_vm6, %v3739_v4, %v1798_v34  ;;  %v1803_v10 = vsel %vm1057_vm3, %v3779_v54, %v1802_v53  ;;  %v1787_v19 = vsel %vm1053_vm1, %v3818_v5, %v3814_v27  ;;  %v394_v56 = vld [vmem:[%s2718_s30 + $0x70] sm:$0xff]  ;;  %v4667_v34 = vld [vmem:[#allocation70_spill] sm:$0xff]  ;;  %s2639_s30 = smov 32  }
  0x93   : > { %v1784_v28 = vsel %vm1061_vm5, %v3503_v43, %v1783_v21  ;;  %v4018_v1 = vsel %vm1065_vm7, %v1775_v63, %v1799_v3  ;;  %v1804_v4 = vsel %vm1059_vm4, %v3783_v0, %v1803_v10  ;;  %v1788_v43 = vsel %vm1055_vm2, %v3825_v58, %v1787_v19  ;;  %v4660_v63 = vld [vmem:[#allocation56_spill] sm:$0xff]  ;;  %v4669_v10 = vld [vmem:[#allocation71_spill] sm:$0xff] }
  0x94   : > { %v1785_v33 = vsel %vm1063_vm6, %v4655_v15, %v1784_v28  ;;  %1812 = vrot.lane.b32.xlu1 %v4018_v1, %s2638_s10  ;;  %v1805_v27 = vsel %vm1061_vm5, %v3791_v52, %v1804_v4  ;;  %v1789_v5 = vsel %vm1057_vm3, %v3829_v20, %v1788_v43  ;;  %v1024_v55 = vrot.slane %v4656_v12, %v2726_v8  ;;  %v4658_v20 = vld [vmem:[#allocation65_spill] sm:$0xff]  ;;  %v4668_v53 = vld [vmem:[#allocation60_spill] sm:$0xff]  ;;  %v4671_v43 = vld [vmem:[#allocation63_spill] sm:$0xff] }
  0x95   : > { %v1786_v54 = vsel %vm1065_vm7, %v1767_v39, %v1785_v33  ;;  %v1806_v0 = vsel %vm1063_vm6, %v3795_v59, %v1805_v27  ;;  %v1790_v58 = vsel %vm1059_vm4, %v3833_v32, %v1789_v5  ;;  %v960_v30 = vrot.slane %v4657_v26, %v2726_v8 }
  0x96   : > { %1808 = vrot.lane.b32.xlu0 %v1786_v54, %s2638_s10  ;;  %v441_v13 = vrot.slane %v394_v56, 7  ;;  %v4044_v18 = vsel %vm1065_vm7, %v1779_v41, %v1806_v0  ;;  %v1791_v52 = vsel %vm1061_vm5, %v3839_v2, %v1790_v58  ;;  %v1081_v24 = vsel %vm1053_vm1, %v4658_v20, %v1024_v55  ;;  %v4666_v41 = vld [vmem:[#allocation59_spill] sm:$0xff]  ;;  %v4670_v56 = vld [vmem:[#allocation62_spill] sm:$0xff] }
  0x97   : > { %v442_v47 = vrot.slane %v4027_v62, 7  ;;  %v1792_v59 = vsel %vm1063_vm6, %v3843_v22, %v1791_v52  ;;  %v1082_v32 = vsel %vm1055_vm2, %v4659_v11, %v1081_v24  ;;  %v1067_v46 = vsel %vm1053_vm1, %v4660_v63, %v960_v30  ;;  %v4672_v52 = vld [vmem:[#allocation2_spill] sm:$0xff] }
  0x98   : > { %v475_v35 = vsel %vm416_vm0, 0.0, %v441_v13  ;;  %1814 = vrot.lane.b32.xlu1 %v4044_v18, %s2638_s10  ;;  %v4060_v2 = vsel %vm1065_vm7, %v1771_v29, %v1792_v59  ;;  %v1083_v50 = vsel %vm1057_vm3, %v4661_v45, %v1082_v32  ;;  %v1068_v31 = vsel %vm1055_vm2, %v4662_v36, %v1067_v46 }
  0x99   : > { %v443_v22 = vsel %vm416_vm0, %v441_v13, %v442_v47  ;;  %v1084_v39 = vsel %vm1059_vm4, %v4663_v40, %v1083_v50  ;;  %v1069_v44 = vsel %vm1057_vm3, %v4664_v23, %v1068_v31  ;;  %v843_v25 = vcombine.high %v475_v35, %v475_v35  ;;  %v4674_v31 = vld [vmem:[#allocation50_spill] sm:$0xff]  ;;  %v4675_v23 = vld [vmem:[#allocation51_spill] sm:$0xff] }
  0x9a   : > { %1810 = vrot.lane.b32.xlu0 %v4060_v2, %s2638_s10  ;;  %v850_v48 = vrot.slane %v475_v35, %v2724_v7  ;;  %v1085_v14 = vsel %vm1061_vm5, %v4665_v42, %v1084_v39  ;;  %v1070_v51 = vsel %vm1059_vm4, %v4666_v41, %v1069_v44  ;;  %v860_v38 = vcombine.high %v443_v22, %v443_v22  ;;  %v4673_v35 = vld [vmem:[#allocation49_spill] sm:$0xff] }
  0x9b   : > { %v867_v9 = vrot.slane %v443_v22, %v2724_v7  ;;  %v1086_v21 = vsel %vm1063_vm6, %v4667_v34, %v1085_v14  ;;  %v1071_v29 = vsel %vm1061_vm5, %v4668_v53, %v1070_v51  ;;  %v857_v3 = vrot.slane %v843_v25, %v2724_v7  ;;  %v4676_v14 = vld [vmem:[#allocation52_spill] sm:$0xff] }
  0x9c   : > { %v858_v28 = vcombine.high %v850_v48, %v850_v48  ;;  %v4087_v19 = vsel %vm1065_vm7, %v4669_v10, %v1086_v21  ;;  %v1072_v15 = vsel %vm1063_vm6, %v4670_v56, %v1071_v29  ;;  %v874_v33 = vrot.slane %v860_v38, %v2724_v7  ;;  %v4677_v21 = vld [vmem:[#allocation53_spill] sm:$0xff] }
  0x9d   : > { %v875_v4 = vcombine.high %v867_v9, %v867_v9  ;;  %1863 = vrot.lane.b32.xlu1 %v4087_v19, %s2639_s30  ;;  %v4097_v54 = vsel %vm1065_vm7, %v4671_v43, %v1072_v15  ;;  %v859_v27 = vcombine.high %v857_v3, %v857_v3  ;;  %v1823_v5 = vrot.slane %v850_v48, %v2726_v8 }
  0x9e   : > { %v1827_v12 = vrot.slane %v858_v28, %v2726_v8  ;;  %1859 = vrot.lane.b32.xlu0 %v4097_v54, %s2639_s30  ;;  %v876_v55 = vcombine.high %v874_v33, %v874_v33  ;;  %v1831_v0 = vrot.slane %v857_v3, %v2726_v8  ;;  %v1839_v58 = vrot.slane %v867_v9, %v2726_v8 }
  0x9f   : > { %v1835_v26 = vrot.slane %v859_v27, %v2726_v8  ;;  %v1843_v30 = vrot.slane %v875_v4, %v2726_v8  ;;  %v992_v20 = vrot.slane %v4672_v52, %v2726_v8  ;;  %v1847_v24 = vrot.slane %v874_v33, %v2726_v8  ;;  %v373_v52 = vld [vmem:[%s349_s9 + $0x8] sm:$0xff] }
  0xa0   : > { %v1852_v13 = vsel %vm1053_vm1, %v1827_v12, %v1823_v5  ;;  %v1874_v11 = vrot.slane %v850_v48, %v2737_v16  ;;  %v1878_v32 = vrot.slane %v858_v28, %v2737_v16  ;;  %v1851_v63 = vrot.slane %v876_v55, %v2726_v8 }
  0xa1   : > { %v1853_v59 = vsel %vm1055_vm2, %v1831_v0, %v1852_v13  ;;  %v1074_v45 = vsel %vm1053_vm1, %v4673_v35, %v992_v20  ;;  %v1882_v50 = vrot.slane %v857_v3, %v2737_v16  ;;  %v1886_v40 = vrot.slane %v859_v27, %v2737_v16  ;;  %v4678_v3 = vld [vmem:[#allocation54_spill] sm:$0xff]  ;;  %v1253_v20 = vpop.permute.xlu0 %1252 }
  0xa2   : > { %v1854_v46 = vsel %vm1057_vm3, %v1835_v26, %v1853_v59  ;;  %v1075_v22 = vsel %vm1055_vm2, %v4674_v31, %v1074_v45  ;;  %v1890_v25 = vrot.slane %v867_v9, %v2737_v16  ;;  %v1894_v48 = vrot.slane %v875_v4, %v2737_v16  ;;  %v1251_v59 = vpop.permute.xlu1 %1250  ;;  %v4681_v45 = vld [vmem:[#allocation10_spill] sm:$0xff] }
  0xa3   : > { %v1855_v36 = vsel %vm1059_vm4, %v1839_v58, %v1854_v46  ;;  %v1076_v44 = vsel %vm1057_vm3, %v4675_v23, %v1075_v22  ;;  %v4139_v51 = vrot.slane %v874_v33, %v2737_v16  ;;  %v1903_v38 = vsel %vm1053_vm1, %v1878_v32, %v1874_v11  ;;  %v4679_v33 = vld [vmem:[#allocation55_spill] sm:$0xff] }
  0xa4   : > { %v1856_v39 = vsel %vm1061_vm5, %v1843_v30, %v1855_v36  ;;  %v1077_v41 = vsel %vm1059_vm4, %v4676_v14, %v1076_v44  ;;  %v4149_v53 = vrot.slane %v876_v55, %v2737_v16  ;;  %v1904_v29 = vsel %vm1055_vm2, %v1882_v50, %v1903_v38  ;;  %v372_v55 = vld [vmem:[%s349_s9] sm:$0xff] }
  0xa5   : > { %v1857_v42 = vsel %vm1063_vm6, %v1847_v24, %v1856_v39  ;;  %v1078_v9 = vsel %vm1061_vm5, %v4677_v21, %v1077_v41  ;;  %v1905_v10 = vsel %vm1057_vm3, %v1886_v40, %v1904_v29  ;;  %v485_v56 = vsel %vm416_vm0, %v442_v47, 0.0  ;;  %v4682_v41 = vld [vmem:[#allocation7_spill] sm:$0xff]  ;;  %v4683_v29 = vld [vmem:[#allocation73_spill] sm:$0xff] }
  0xa6   : > { %v1858_v34 = vsel %vm1065_vm7, %v1851_v63, %v1857_v42  ;;  %v1079_v28 = vsel %vm1063_vm6, %v4678_v3, %v1078_v9  ;;  %v1926_v15 = vsel %vm1053_vm1, %v1831_v0, %v1827_v12  ;;  %v1906_v43 = vsel %vm1059_vm4, %v1890_v25, %v1905_v10 }
  0xa7   : > { %1865 = vrot.lane.b32.xlu1 %v1858_v34, %s2639_s30  ;;  %v1080_v4 = vsel %vm1065_vm7, %v4679_v33, %v1079_v28  ;;  %v1927_v27 = vsel %vm1055_vm2, %v1835_v26, %v1926_v15  ;;  %v1949_v5 = vsel %vm1053_vm1, %v1882_v50, %v1878_v32  ;;  %v1907_v13 = vsel %vm1061_vm5, %v1894_v48, %v1906_v43  ;;  %v4680_v26 = vld [vmem:[#allocation26_spill] sm:$0xff] }
  0xa8   : > { %1861 = vrot.lane.b32.xlu0 %v1080_v4, %s2639_s30  ;;  %v1928_v62 = vsel %vm1057_vm3, %v1839_v58, %v1927_v27  ;;  %v1908_v47 = vsel %vm1063_vm6, %v4139_v51, %v1907_v13  ;;  %v377_v0 = vstv %s376_s13  ;;  %v883_v11 = vrot.slane %v485_v56, %v2724_v7  ;;  %v1255_v14 = vpop.permute.xlu1 %1254 }
  0xa9   : > { %v1929_v12 = vsel %vm1059_vm4, %v1843_v30, %v1928_v62  ;;  %v1950_v32 = vsel %vm1055_vm2, %v1886_v40, %v1949_v5  ;;  %v378_v46 = vmul.f32 %v377_v0, %v372_v55  ;;  %v1909_v58 = vsel %vm1065_vm7, %v4149_v53, %v1908_v47  ;;  %v4685_v47 = vld [vmem:[#allocation64_spill] sm:$0xff] }
  0xaa   : > { %v4177_v35 = vmul.f32 %v377_v0, %v373_v52  ;;  %v1930_v30 = vsel %vm1061_vm5, %v1847_v24, %v1929_v12  ;;  %v4182_v36 = vsel %vm2116_vm8, %v1080_v4, %v1253_v20  ;;  %v1951_v31 = vsel %vm1057_vm3, %v1890_v25, %v1950_v32 }
  0xab   : > { %1914 = vrot.lane.b32.xlu1 %v4680_v26, %s2640_s14  ;;  %v444_v50 = vrot.slane %v378_v46, 7  ;;  %v4188_v40 = vsel %vm2116_vm8, %v4097_v54, %v1251_v59  ;;  %v1925_v39 = vrot.slane %v883_v11, %v2726_v8  ;;  %v1931_v44 = vsel %vm1063_vm6, %v1851_v63, %v1930_v30  ;;  %v4686_v26 = vld [vmem:[#allocation18_spill] sm:$0xff] }
  0xac   : > { %1910 = vrot.lane.b32.xlu0 %v4681_v45, %s2640_s14  ;;  %v445_v22 = vrot.slane %v4177_v35, 7  ;;  %v1952_v54 = vsel %vm1059_vm4, %v1894_v48, %v1951_v31  ;;  %v4201_v38 = vsel %vm2116_vm8, %v4087_v19, %v1255_v14  ;;  %v4684_v19 = vld [vmem:[#allocation72_spill] sm:$0xff]  ;;  %v1948_v62 = vrot.slane %v883_v11, %v2737_v16 }
  0xad   : > { %v476_v23 = vsel %vm416_vm0, 0.0, %v444_v50  ;;  %v1932_v3 = vsel %vm1065_vm7, %v1925_v39, %v1931_v44  ;;  %v1953_v15 = vsel %vm1061_vm5, %v4139_v51, %v1952_v54  ;;  %v4687_v45 = vld [vmem:[#allocation4_spill] sm:$0xff]  ;;  %v4688_v44 = vld [vmem:[#allocation23_spill] sm:$0xff]  ;;  %v487_v54 = vld [vmem:[%s4430_s3] sm:$0xff] }
  0xae   : > { %v446_v24 = vsel %vm416_vm0, %v444_v50, %v445_v22  ;;  %v884_v42 = vcombine.high %v476_v23, %v476_v23  ;;  %v891_v25 = vrot.slane %v476_v23, %v2724_v7  ;;  %v1954_v12 = vsel %vm1063_vm6, %v4149_v53, %v1953_v15 }
  0xaf   : > { %1916 = vrot.lane.b32.xlu1 %v1909_v58, %s2640_s14  ;;  %v908_v63 = vrot.slane %v446_v24, %v2724_v7  ;;  %v901_v10 = vcombine.high %v446_v24, %v446_v24  ;;  %v1955_v32 = vsel %vm1065_vm7, %v1948_v62, %v1954_v12 }
  0xb0   : > { %1912 = vrot.lane.b32.xlu0 %v4682_v41, %s2640_s14  ;;  %v898_v34 = vrot.slane %v884_v42, %v2724_v7  ;;  %v899_v21 = vcombine.high %v891_v25, %v891_v25  ;;  %v1971_v9 = vrot.slane %v891_v25, %v2726_v8  ;;  %v2022_v33 = vrot.slane %v891_v25, %v2737_v16  ;;  %v4245_v42 = vpop.permute.xlu0 %1528 }
  0xb1   : > { %v916_v4 = vcombine.high %v908_v63, %v908_v63  ;;  %v1987_v55 = vrot.slane %v908_v63, %v2726_v8  ;;  %v915_v52 = vrot.slane %v901_v10, %v2724_v7  ;;  %v4237_v31 = vrot.slane %v908_v63, %v2737_v16 }
  0xb2   : > { %v900_v28 = vcombine.high %v898_v34, %v898_v34  ;;  %v1975_v48 = vrot.slane %v899_v21, %v2726_v8  ;;  %v1979_v56 = vrot.slane %v898_v34, %v2726_v8  ;;  %v2026_v5 = vrot.slane %v899_v21, %v2737_v16 }
  0xb3   : > { %1937 = vrot.lane.b32.xlu1 %v4683_v29, %s2641_s22  ;;  %v2030_v0 = vrot.slane %v898_v34, %v2737_v16  ;;  %v1991_v20 = vrot.slane %v916_v4, %v2726_v8  ;;  %v917_v46 = vcombine.high %v915_v52, %v915_v52  ;;  %v1995_v53 = vrot.slane %v915_v52, %v2726_v8  ;;  %v488_v34 = vld [vmem:[%s4430_s3 + $0x8] sm:$0xff]  ;;  %v4689_v29 = vld [vmem:[#allocation61_spill] sm:$0xff] }
  0xb4   : > { %1933 = vrot.lane.b32.xlu0 %v4684_v19, %s2641_s22  ;;  %v1983_v43 = vrot.slane %v900_v28, %v2726_v8  ;;  %v2000_v27 = vsel %vm1053_vm1, %v1975_v48, %v1971_v9  ;;  %v2051_v59 = vsel %vm1053_vm1, %v2026_v5, %v2022_v33  ;;  %v2034_v58 = vrot.slane %v900_v28, %v2737_v16 }
  0xb5   : > { %v2001_v13 = vsel %vm1055_vm2, %v1979_v56, %v2000_v27  ;;  %v2052_v30 = vsel %vm1055_vm2, %v2030_v0, %v2051_v59  ;;  %v4240_v39 = vrot.slane %v917_v46, %v2726_v8  ;;  %v4248_v25 = vrot.slane %v916_v4, %v2737_v16 }
  0xb6   : > { %v2002_v51 = vsel %vm1057_vm3, %v1983_v43, %v2001_v13  ;;  %v2053_v23 = vsel %vm1057_vm3, %v2034_v58, %v2052_v30  ;;  %v2074_v14 = vsel %vm1053_vm1, %v1979_v56, %v1975_v48  ;;  %v2511_v63 = vpack.c.bf16 %v488_v34, %v487_v54  ;;  %v490_v48 = vld [vmem:[%s4430_s3 + $0x18] sm:$0xff] }
  0xb7   : > { %1939 = vrot.lane.b32.xlu1 %v1932_v3, %s2641_s22  ;;  %v2003_v11 = vsel %vm1059_vm4, %v1987_v55, %v2002_v51  ;;  %v2054_v21 = vsel %vm1059_vm4, %v4237_v31, %v2053_v23  ;;  %v4266_v3 = vrot.slane %v915_v52, %v2737_v16  ;;  %v2075_v28 = vsel %vm1055_vm2, %v1983_v43, %v2074_v14  ;;  %v4690_v43 = vld [vmem:[#allocation47_spill] sm:$0xff]  ;;  %v4693_v54 = vld [vmem:[#allocation21_spill] sm:$0xff] }
  0xb8   : > { %1935 = vrot.lane.b32.xlu0 %v4685_v47, %s2641_s22  ;;  %v2004_v50 = vsel %vm1061_vm5, %v1991_v20, %v2003_v11  ;;  %v4251_v41 = vpop.permute.xlu1 %1532  ;;  %2512 = vmatprep.subr.bf16.mxu0 %v2511_v63  ;;  %v2055_v10 = vsel %vm1061_vm5, %v4248_v25, %v2054_v21  ;;  %v2050_v15 = vrot.slane %v917_v46, %v2737_v16  ;;  %v486_v13 = vsel %vm416_vm0, %v445_v22, 0.0  ;;  %v492_v51 = vld [vmem:[%s4430_s3 + $0x28] sm:$0xff]  ;;  %v4695_v21 = vld [vmem:[#allocation9_spill] sm:$0xff] }
  0xb9   : > { %v2005_v24 = vsel %vm1063_vm6, %v1995_v53, %v2004_v50  ;;  %2527 = vmatprep.subr.bf16.mxu1 %v2511_v63  ;;  %2514 = vmatpush3.bf16.msra.mxu0 %v2511_v63  ;;  %v2076_v33 = vsel %vm1057_vm3, %v1987_v55, %v2075_v28  ;;  %v2056_v27 = vsel %vm1063_vm6, %v4266_v3, %v2055_v10  ;;  %v491_v55 = vld [vmem:[%s4430_s3 + $0x20] sm:$0xff]  ;;  %vm2156_vm0 = vcmask 293888  }
  0xba   : > { %v2006_v9 = vsel %vm1065_vm7, %v4240_v39, %v2005_v24  ;;  %2531 = vmatpush3.bf16.msra.mxu1 %v2511_v63  ;;  %v2097_v52 = vsel %vm1053_vm1, %v2030_v0, %v2026_v5  ;;  %v2077_v35 = vsel %vm1059_vm4, %v1991_v20, %v2076_v33  ;;  %v2057_v22 = vsel %vm1065_vm7, %v2050_v15, %v2056_v27 }
  0xbb   : > { %1960 = vrot.lane.b32.xlu1 %v4686_v26, %s2642_s23  ;;  %v924_v5 = vrot.slane %v486_v13, %v2724_v7  ;;  %v2098_v47 = vsel %vm1055_vm2, %v2034_v58, %v2097_v52  ;;  %v2078_v0 = vsel %vm1061_vm5, %v1995_v53, %v2077_v35  ;;  %v494_v7 = vld [vmem:[%s4430_s3 + $0x38] sm:$0xff] }
  0xbc   : > { %1956 = vrot.lane.b32.xlu0 %v4687_v45, %s2642_s23  ;;  %v2099_v26 = vsel %vm1057_vm3, %v4237_v31, %v2098_v47 }
  0xbd   : > { %v2073_v20 = vrot.slane %v924_v5, %v2726_v8  ;;  %v2100_v58 = vsel %vm1059_vm4, %v4248_v25, %v2099_v26  ;;  %v2096_v23 = vrot.slane %v924_v5, %v2737_v16  ;;  %v4694_v16 = vld [vmem:[#allocation11_spill] sm:$0xff] }
  0xbe   : > { %v2101_v31 = vsel %vm1061_vm5, %v4266_v3, %v2100_v58 }
  0xbf   : > { %1962 = vrot.lane.b32.xlu1 %v1955_v32, %s2642_s23 }
  0xc0   : > { %1958 = vrot.lane.b32.xlu0 %v4688_v44, %s2642_s23  ;;  %s2645_s23 = smov 56   ;;  %v2102_v44 = vsel %vm1063_vm6, %v2050_v15, %v2101_v31 }
  0xc1   : > { %v1531_v56 = vpop.permute.xlu0 %1530  ;;  %v2103_v14 = vsel %vm1065_vm7, %v2096_v23, %v2102_v44 }
  0xc3   : > { %2011 = vrot.lane.b32.xlu1 %v3707_v57, %s2643_s29  ;;  %v489_v57 = vld [vmem:[%s4430_s3 + $0x10] sm:$0xff]  ;;  %v1309_v4 = vpop.permute.xlu1 %1308 }
  0xc4   : > { %2007 = vrot.lane.b32.xlu0 %v4689_v29, %s2643_s29  ;;  %v2515_v19 = vpack.c.bf16 %v490_v48, %v489_v57  ;;  %v2124_v62 = vsel %vm2121_vm9, %v4182_v36, %v1309_v4  ;;  %v2519_v36 = vpack.c.bf16 %v492_v51, %v491_v55  ;;  %v4697_v29 = vld [vmem:[#allocation12_spill] sm:$0xff]  ;;  %v4698_v57 = vld [vmem:[#allocation14_spill] sm:$0xff] }
  0xc6   : > { %2516 = vmatprep.subr.bf16.mxu0 %v2515_v19  ;;  %2528 = vmatprep.subr.bf16.mxu1 %v2515_v19 }
  0xc7   : > { %2013 = vrot.lane.b32.xlu1 %v2006_v9, %s2643_s29  ;;  %2518 = vmatpush3.bf16.msra.mxu0 %v2515_v19 }
  0xc8   : > { %2009 = vrot.lane.b32.xlu0 %v4690_v43, %s2643_s29  ;;  %2532 = vmatpush3.bf16.msra.mxu1 %v2515_v19  ;;  %s2462_s29 = sshll.u32 %s360_s28, 3 }
  0xc9   : > { %v1307_v12 = vpop.permute.xlu0 %1306  ;;  %2520 = vmatprep.subr.bf16.mxu0 %v2519_v36  ;;  %2529 = vmatprep.subr.bf16.mxu1 %v2519_v36  ;;  %s362_s7 = scalar_lea.vmem %s4431_s4, %s2462_s29 }
  0xca   : > { %v2123_v59 = vsel %vm2121_vm9, %v4188_v40, %v1307_v12  ;;  %v2079_v40 = vsel %vm1063_vm6, %v4240_v39, %v2078_v0 }
  0xcb   : > { %2062 = vrot.lane.b32.xlu1 %v3868_v61, %s2644_s8  ;;  %2522 = vmatpush3.bf16.msra.mxu0 %v2519_v36  ;;  %v493_v61 = vld [vmem:[%s4430_s3 + $0x30] sm:$0xff]  ;;  %v2080_v45 = vsel %vm1065_vm7, %v2073_v20, %v2079_v40 }
  0xcc   : > { %2058 = vrot.lane.b32.xlu0 %v3900_v6, %s2644_s8  ;;  %2533 = vmatpush3.bf16.msra.mxu1 %v2519_v36  ;;  %v2523_v6 = vpack.c.bf16 %v494_v7, %v493_v61 }
  0xcd   : > { %v1311_v11 = vpop.permute.xlu1 %1310 }
  0xce   : > { %2524 = vmatprep.subr.bf16.mxu0 %v2523_v6  ;;  %v2125_v32 = vsel %vm2121_vm9, %v4201_v38, %v1311_v11  ;;  %v1363_v46 = vpop.permute.xlu0 %1362  ;;  %2530 = vmatprep.subr.bf16.mxu1 %v2523_v6  ;;  %v4691_v38 = vld [vmem:[#allocation20_spill] sm:$0xff] }
  0xcf   : > { %2064 = vrot.lane.b32.xlu1 %v2057_v22, %s2644_s8  ;;  %2526 = vmatpush3.bf16.msra.mxu0 %v2523_v6  ;;  %v928_v50 = vrot.slane %v4691_v38, %v2726_v8 }
  0xd0   : > { %2060 = vrot.lane.b32.xlu0 %v3799_v37, %s2644_s8  ;;  %v2128_v37 = vsel %vm2126_vm10, %v2123_v59, %v1363_v46  ;;  %2534 = vmatpush3.bf16.msra.mxu1 %v2523_v6 }
  0xd1   : > { %v2133_v53 = vsel %vm2131_vm11, %v2128_v37, %v1531_v56 }
  0xd2   : > { %v1365_v30 = vpop.permute.xlu1 %1364 }
  0xd3   : > { %2085 = vrot.lane.b32.xlu1 %v3968_v60, %s2645_s23  ;;  %v2129_v60 = vsel %vm2126_vm10, %v2124_v62, %v1365_v30 }
  0xd4   : > { %2081 = vrot.lane.b32.xlu0 %v3988_v49, %s2645_s23  ;;  %v2134_v39 = vsel %vm2131_vm11, %v2129_v60, %v4251_v41  ;;  %v4692_v49 = vld [vmem:[#allocation19_spill] sm:$0xff] }
  0xd5   : > { %v1054_v24 = vsel %vm1053_vm1, %v4692_v49, %v928_v50  ;;  %vm2161_vm1 = vcmask 326656  }
  0xd6   : > { %v1056_v41 = vsel %vm1055_vm2, %v4693_v54, %v1054_v24  ;;  %v1697_v34 = vpop.permute.xlu0 %1696  ;;  %vm2166_vm2 = vcmask 359424  }
  0xd7   : > { %2087 = vrot.lane.b32.xlu1 %v2080_v45, %s2645_s23  ;;  %v1367_v25 = vpop.permute.xlu1 %1366 }
  0xd8   : > { %2083 = vrot.lane.b32.xlu0 %v3911_v17, %s2645_s23  ;;  %v2130_v8 = vsel %vm2126_vm10, %v2125_v32, %v1367_v25  ;;  %v1058_v17 = vsel %vm1057_vm3, %v4694_v16, %v1056_v41  ;;  %vm2171_vm3 = vcmask 392192  }
  0xd9   : > { %v1060_v63 = vsel %vm1059_vm4, %v4695_v21, %v1058_v17  ;;  %vm2176_vm4 = vcmask 424960  }
  0xdb   : > { %2108 = vrot.lane.b32.xlu1 %v4044_v18, %s2646_s25  ;;  %v4696_v18 = vld [vmem:[#allocation13_spill] sm:$0xff] }
  0xdc   : > { %2104 = vrot.lane.b32.xlu0 %v4060_v2, %s2646_s25  ;;  %v1062_v9 = vsel %vm1061_vm5, %v4696_v18, %v1060_v63  ;;  %vm2181_vm5 = vcmask 457728  }
  0xdd   : > { %v1064_v3 = vsel %vm1063_vm6, %v4697_v29, %v1062_v9  ;;  %vm2186_vm6 = vcmask 490496  }
  0xde   : > { %v1066_v2 = vsel %vm1065_vm7, %v4698_v57, %v1064_v3  ;;  %vm2191_vm7 = vcmask 523264  }
  0xdf   : > { %2110 = vrot.lane.b32.xlu1 %v2103_v14, %s2646_s25 }
  0xe0   : > { %2106 = vrot.lane.b32.xlu0 %v4018_v1, %s2646_s25 }
  0xe3   : > { %v1249_v28 = vpop.permute.xlu0 %1248 }
  0xe4   : > { %v2117_v56 = vsel %vm2116_vm8, %v1066_v2, %v1249_v28 }
  0xe8   : > { %v1535_v10 = vpop.permute.xlu1 %1534 }
  0xe9   : > { %v2135_v48 = vsel %vm2131_vm11, %v2130_v8, %v1535_v10 }
  0xec   : > { %v1305_v1 = vpop.permute.xlu0 %1304 }
  0xed   : > { %v2122_v19 = vsel %vm2121_vm9, %v2117_v56, %v1305_v1 }
  0xf0   : > { %v1701_v15 = vpop.permute.xlu1 %1700 }
  0xf1   : > { %v2139_v33 = vsel %vm2136_vm12, %v2134_v39, %v1701_v15  ;;  %v1361_v4 = vpop.permute.xlu0 %1360 }
  0xf2   : > { %v2127_v43 = vsel %vm2126_vm10, %v2122_v19, %v1361_v4 }
  0xf3   : > { %v2132_v27 = vsel %vm2131_vm11, %v2127_v43, %v4245_v42 }
  0xf4   : > { %v2137_v13 = vsel %vm2136_vm12, %v2132_v27, %v1697_v34 }
  0xf6   : > { %v1703_v62 = vpop.permute.xlu1 %1702 }
  0xf7   : > { %v2140_v52 = vsel %vm2136_vm12, %v2135_v48, %v1703_v62 }
  0xf9   : > { %v1699_v55 = vpop.permute.xlu0 %1698 }
  0xfa   : > { %v2138_v51 = vsel %vm2136_vm12, %v2133_v53, %v1699_v55 }
  0xfc   : > { %v1757_v35 = vpop.permute.xlu1 %1756 }
  0xfd   : > { %v2144_v25 = vsel %vm2141_vm13, %v2139_v33, %v1757_v35 }
  0xff   : > { %v1753_v36 = vpop.permute.xlu0 %1752 }
 0x100   : > { %v2142_v54 = vsel %vm2141_vm13, %v2137_v13, %v1753_v36 }
 0x101   : > { %v1759_v22 = vpop.permute.xlu1 %1758 }
 0x102   : > { %v2145_v21 = vsel %vm2141_vm13, %v2140_v52, %v1759_v22 }
 0x103   : > { %v1755_v5 = vpop.permute.xlu0 %1754 }
 0x104   : > { %v2143_v10 = vsel %vm2141_vm13, %v2138_v51, %v1755_v5 }
 0x106   : > { %v1813_v47 = vpop.permute.xlu1 %1812 }
 0x107   : > { %v2149_v14 = vsel %vm2146_vm14, %v2144_v25, %v1813_v47 }
 0x108   : > { %v1809_v12 = vpop.permute.xlu0 %1808 }
 0x109   : > { %v2147_v17 = vsel %vm2146_vm14, %v2142_v54, %v1809_v12 }
 0x10a   : > { %v1815_v0 = vpop.permute.xlu1 %1814 }
 0x10b   : > { %v2150_v29 = vsel %vm2146_vm14, %v2145_v21, %v1815_v0 }
 0x10c   : > { %v1811_v59 = vpop.permute.xlu0 %1810 }
 0x10d   : > { %v2148_v1 = vsel %vm2146_vm14, %v2143_v10, %v1811_v59 }
 0x10f   : > { %v1864_v61 = vpop.permute.xlu1 %1863 }
 0x110   : > { %v1860_v7 = vpop.permute.xlu0 %1859  ;;  %v2154_v41 = vsel %vm2151_vm15, %v2149_v14, %v1864_v61 }
 0x111   : > { %v2152_v63 = vsel %vm2151_vm15, %v2147_v17, %v1860_v7 }
 0x119   : > { %v1866_v6 = vpop.permute.xlu1 %1865 }
 0x11a   : > { %v1862_v20 = vpop.permute.xlu0 %1861  ;;  %v2155_v57 = vsel %vm2151_vm15, %v2150_v29, %v1866_v6 }
 0x11b   : > { %v2153_v4 = vsel %vm2151_vm15, %v2148_v1, %v1862_v20 }
 0x11d   : > { %v1915_v26 = vpop.permute.xlu1 %1914 }
 0x11e   : > { %v1911_v40 = vpop.permute.xlu0 %1910  ;;  %v2159_v34 = vsel %vm2156_vm0, %v2154_v41, %v1915_v26 }
 0x11f   : > { %v2157_v3 = vsel %vm2156_vm0, %v2152_v63, %v1911_v40 }
 0x121   : > { %v1917_v42 = vpop.permute.xlu1 %1916 }
 0x122   : > { %v1913_v11 = vpop.permute.xlu0 %1912  ;;  %v2160_v19 = vsel %vm2156_vm0, %v2155_v57, %v1917_v42 }
 0x123   : > { %v2158_v52 = vsel %vm2156_vm0, %v2153_v4, %v1913_v11 }
 0x125   : > { %v1938_v32 = vpop.permute.xlu1 %1937 }
 0x126   : > { %v1934_v46 = vpop.permute.xlu0 %1933  ;;  %v2164_v18 = vsel %vm2161_vm1, %v2159_v34, %v1938_v32 }
 0x127   : > { %v2162_v2 = vsel %vm2161_vm1, %v2157_v3, %v1934_v46 }
 0x129   : > { %v1940_v58 = vpop.permute.xlu1 %1939 }
 0x12a   : > { %v1936_v37 = vpop.permute.xlu0 %1935  ;;  %v2165_v43 = vsel %vm2161_vm1, %v2160_v19, %v1940_v58 }
 0x12b   : > { %v2163_v36 = vsel %vm2161_vm1, %v2158_v52, %v1936_v37 }
 0x12d   : > { %v1961_v45 = vpop.permute.xlu1 %1960 }
 0x12e   : > { %v1957_v53 = vpop.permute.xlu0 %1956  ;;  %v2169_v28 = vsel %vm2166_vm2, %v2164_v18, %v1961_v45 }
 0x12f   : > { %v2167_v15 = vsel %vm2166_vm2, %v2162_v2, %v1957_v53 }
 0x131   : > { %v1963_v30 = vpop.permute.xlu1 %1962 }
 0x132   : > { %v1959_v38 = vpop.permute.xlu0 %1958  ;;  %v2170_v55 = vsel %vm2166_vm2, %v2165_v43, %v1963_v30 }
 0x133   : > { %v2168_v12 = vsel %vm2166_vm2, %v2163_v36, %v1959_v38 }
 0x135   : > { %v2012_v50 = vpop.permute.xlu1 %2011 }
 0x136   : > { %v2008_v31 = vpop.permute.xlu0 %2007  ;;  %v2174_v48 = vsel %vm2171_vm3, %v2169_v28, %v2012_v50 }
 0x137   : > { %v2172_v27 = vsel %vm2171_vm3, %v2167_v15, %v2008_v31 }
 0x139   : > { %v2014_v60 = vpop.permute.xlu1 %2013 }
 0x13a   : > { %v2010_v39 = vpop.permute.xlu0 %2009  ;;  %v2175_v22 = vsel %vm2171_vm3, %v2170_v55, %v2014_v60 }
 0x13b   : > { %v2173_v61 = vsel %vm2171_vm3, %v2168_v12, %v2010_v39 }
 0x13d   : > { %v2063_v23 = vpop.permute.xlu1 %2062 }
 0x13e   : > { %v2059_v44 = vpop.permute.xlu0 %2058  ;;  %v2179_v33 = vsel %vm2176_vm4, %v2174_v48, %v2063_v23 }
 0x13f   : > { %v2177_v51 = vsel %vm2176_vm4, %v2172_v27, %v2059_v44 }
 0x141   : > { %v2065_v49 = vpop.permute.xlu1 %2064 }
 0x142   : > { %v2061_v24 = vpop.permute.xlu0 %2060  ;;  %v2180_v0 = vsel %vm2176_vm4, %v2175_v22, %v2065_v49 }
 0x143   : > { %v2178_v20 = vsel %vm2176_vm4, %v2173_v61, %v2061_v24 }
 0x145   : > { %v2086_v8 = vpop.permute.xlu1 %2085 }
 0x146   : > { %v2082_v16 = vpop.permute.xlu0 %2081  ;;  %v2184_v13 = vsel %vm2181_vm5, %v2179_v33, %v2086_v8 }
 0x147   : > { %v2182_v5 = vsel %vm2181_vm5, %v2177_v51, %v2082_v16 }
 0x149   : > { %v2088_v9 = vpop.permute.xlu1 %2087 }
 0x14a   : > { %v2084_v56 = vpop.permute.xlu0 %2083  ;;  %v2185_v7 = vsel %vm2181_vm5, %v2180_v0, %v2088_v9 }
 0x14b   : > { %v2183_v40 = vsel %vm2181_vm5, %v2178_v20, %v2084_v56 }
 0x14d   : > { %v2109_v62 = vpop.permute.xlu1 %2108 }
 0x14e   : > { %v2189_v35 = vsel %vm2186_vm6, %v2184_v13, %v2109_v62  ;;  %v2105_v47 = vpop.permute.xlu0 %2104 }
 0x14f   : > { %2508 = vmatprep.mubr.msk.f32.mxu1 %vm2191_vm7, %v2189_v35  ;;  %v2187_v59 = vsel %vm2186_vm6, %v2182_v5, %v2105_v47 }
 0x150   : > { %2505 = vmatprep.mubr.msk.f32.mxu0 %vm2191_vm7, %v2187_v59 }
 0x151   : > { %v2111_v6 = vpop.permute.xlu1 %2110 }
 0x152   : > { %v2190_v26 = vsel %vm2186_vm6, %v2185_v7, %v2111_v6  ;;  %v2107_v42 = vpop.permute.xlu0 %2106 }
 0x153   : > { %2509 = vmatmul.mubr.msk.f32.vlgmr.msra.gmra.mrb[0].mxu1 %vm2191_vm7, %v2190_v26  ;;  %v2188_v11 = vsel %vm2186_vm6, %v2183_v40, %v2107_v42 }
 0x154   : > { %2506 = vmatmul.mubr.msk.f32.vlgmr.msra.gmra.mrb[0].mxu0 %vm2191_vm7, %v2188_v11 }
 0x226   : > { %v2510_v32 = vpop.f32.mrb[0].mxu1 }
 0x227   : > { %2292 = vst.msk [vmem:[%s362_s7 + $0x18] sm:$0xff] %vm2121_vm9, %v2510_v32  ;;  %v2280_v46 = vpop.f32.mrb[1].mxu1  ;;  %v2507_v58 = vpop.f32.mrb[0].mxu0 }
 0x228   : > { %2291 = vst.msk [vmem:[%s362_s7 + $0x10] sm:$0xff] %vm2121_vm9, %v2280_v46  ;;  %2290 = vst.msk [vmem:[%s362_s7 + $0x8] sm:$0xff] %vm2121_vm9, %v2507_v58  ;;  %v2270_v37 = vpop.f32.mrb[1].mxu0 }
 0x229   : > { %2289 = vst.msk [vmem:[%s362_s7] sm:$0xff] %vm2121_vm9, %v2270_v37 }
 0x22a PF: > { %s14_s19 = sadd.s32 1, %s2629_s19   ;;  %s4699_s15 = smov %s2621_s17 }
 0x22b   : > { %p11_p13 = scmp.ge.s32.totalorder %s14_s19, 6   ;;  %s4700_s16 = smov %s2625_s18 }
 0x22c   : > { %s4701_s17 = smov %s4704_s20  ;;  %s4702_s18 = smov %s4708_s21 }
 0x22d   :  { %13 = sbr.rel (!%p11_p13) target bundleno = 3 (0x3), region = 72 }

</bundles_post_ra>
